<compile_context>
chip_gen: v5e
topology: v5e:2x2
jax: 0.10.0
libtpu: 0.0.40
codegen_flags: <defaults>
</compile_context>

<pallas_src>
import jax
import jax.numpy as jnp
from jax.experimental import pallas as pl
from jax.experimental.pallas import tpu as pltpu


def _tracker_fused_kernel(x_ref,       # (steps*B, 3*size) bf16  all-step [buf.h | s1.h | s2.h]
                          wx_ref,      # (3*size, 4T) bf16  [W_buf; W_s1; W_s2] stacked
                          wl_ref,      # (T, 4T)     bf16  lateral weight
                          b_ref,       # (1, 4T)     f32   lateral bias
                          hc_out_ref,  # (2, B, steps*T) f32  [h | c] lane-dense output slab
                          inp_scratch  # (steps*B, 4T) f32  hoisted projection
                          ):
    tsz = wl_ref.shape[0]
    batch = hc_out_ref.shape[1]
    sb, gdim = inp_scratch.shape
    steps = sb // batch

    # --- Hoisted, MXU-filling projection of all timesteps at once (bf16 -> f32 acc).
    inp_all = jnp.dot(x_ref[...], wx_ref[...], preferred_element_type=jnp.float32)
    # Fold the lateral bias into rows belonging to steps >= 1 (step 0 has self.h is None).
    row = jax.lax.broadcasted_iota(jnp.int32, (sb, gdim), 0)
    inp_all = inp_all + jnp.where(row >= batch, 1.0, 0.0) * b_ref[...]
    inp_scratch[...] = inp_all

    # --- Serial recurrence: only the tiny lateral dot + gate math per step.
    h_bf = jnp.zeros((batch, tsz), jnp.bfloat16)   # Tracker.reset_state(): h = None -> 0
    c = jnp.zeros((batch, tsz), jnp.float32)       # Tracker.reset_state(): c = None -> 0
    for t in range(steps):                         # static, fully unrolled
        inp = inp_scratch[t * batch:(t + 1) * batch, :]
        if t > 0:   # `if self.h is not None` — statically skip lateral at step 0
            inp = inp + jnp.dot(h_bf, wl_ref[...], preferred_element_type=jnp.float32)

        # SPINN lstm(): chunk order along features is (a, i, f, o).
        sig = jax.nn.sigmoid(inp)                  # one full-width EUP pass
        a_t = jnp.tanh(inp[:, :tsz])
        i_s = sig[:, tsz:2 * tsz]
        f_s = sig[:, 2 * tsz:3 * tsz]
        o_s = sig[:, 3 * tsz:]

        c = a_t * i_s + f_s * c
        h = o_s * jnp.tanh(c)
        h_bf = h.astype(jnp.bfloat16)              # bf16 carry feeds next lateral dot

        hc_out_ref[0, :, t * tsz:(t + 1) * tsz] = h
        hc_out_ref[1, :, t * tsz:(t + 1) * tsz] = c


def pack_tracker_params(params):
    """One-time host-side packing: stack the three bias-free projections into a
    single (3*size, 4T) matrix; cast matmul operands to bf16."""
    w_x = jnp.concatenate([params["w_buf"], params["w_s1"], params["w_s2"]], axis=0)
    return {
        "w_x": w_x.astype(jnp.bfloat16),
        "w_lat": params["w_lat"].astype(jnp.bfloat16),
        "b_lat": params["b_lat"].astype(jnp.float32),
    }


@jax.jit
def tracker_unroll(packed, xb_seq, xs1_seq, xs2_seq):
    """Runs `steps` Tracker.forward calls (starting from reset state) in one
    single-grid-step pallas_call.  Returns per-step (h, c), each (steps, B, T)."""
    steps, batch, size = xb_seq.shape
    tsz = packed["w_lat"].shape[0]
    gdim = 4 * tsz

    # All per-step activations concatenated + flattened once on the host side:
    # (steps*B, 3*size) bf16 — one VMEM-resident slab, one MXU-filling dot.
    x_flat = jnp.concatenate([xb_seq, xs1_seq, xs2_seq], axis=-1) \
                .astype(jnp.bfloat16).reshape(steps * batch, 3 * size)

    hc = pl.pallas_call(
        _tracker_fused_kernel,
        grid=(1,),
        in_specs=[
            pl.BlockSpec((steps * batch, 3 * size), lambda i: (0, 0)),
            pl.BlockSpec((3 * size, gdim), lambda i: (0, 0)),
            pl.BlockSpec((tsz, gdim), lambda i: (0, 0)),
            pl.BlockSpec((1, gdim), lambda i: (0, 0)),
        ],
        out_specs=pl.BlockSpec((2, batch, steps * tsz), lambda i: (0, 0, 0)),
        out_shape=jax.ShapeDtypeStruct((2, batch, steps * tsz), jnp.float32),
        scratch_shapes=[
            pltpu.VMEM((steps * batch, gdim), jnp.float32),  # hoisted projection
        ],
        # Single grid step; the recurrence lives inside the kernel.
        # TODO(synk): for batched independent sequences on v7x, add a leading
        # "parallel" grid axis over sequence groups to occupy both TensorCores.
        compiler_params=pltpu.CompilerParams(dimension_semantics=("arbitrary",)),
    )(x_flat, packed["w_x"], packed["w_lat"], packed["b_lat"])

    # Layout plumbing only: lane-dense slab -> (steps, B, T) h and c.
    hc = hc.reshape(2, batch, steps, tsz)
    h_seq = jnp.transpose(hc[0], (1, 0, 2))
    c_seq = jnp.transpose(hc[1], (1, 0, 2))
    return h_seq, c_seq


# TODO(synk): the lateral_tracking=False branch (extra 4T -> T `transform` Linear) is not implemented.


def _reference_unroll(params, xb_seq, xs1_seq, xs2_seq, mixed):
    """Pure-JAX reference of Tracker.forward stepped from reset state.
    mixed=True mirrors the kernel's bf16-operand / f32-accumulate matmuls."""
    cast = (lambda a: a.astype(jnp.bfloat16)) if mixed else (lambda a: a)
    dot = lambda a, b: jnp.dot(cast(a), cast(b), preferred_element_type=jnp.float32)
    steps, batch, _ = xb_seq.shape
    tsz = params["w_lat"].shape[0]
    h = None
    c = jnp.zeros((batch, tsz), jnp.float32)
    hs, cs = [], []
    for t in range(steps):
        inp = (dot(xb_seq[t], params["w_buf"]) + dot(xs1_seq[t], params["w_s1"])
               + dot(xs2_seq[t], params["w_s2"]))
        if h is not None:
            inp = inp + dot(h, params["w_lat"]) + params["b_lat"]
        a, i, f, o = (inp[:, :tsz], inp[:, tsz:2 * tsz],
                      inp[:, 2 * tsz:3 * tsz], inp[:, 3 * tsz:])
        c = jnp.tanh(a) * jax.nn.sigmoid(i) + jax.nn.sigmoid(f) * c
        h = jax.nn.sigmoid(o) * jnp.tanh(c)
        hs.append(h)
        cs.append(c)
    return jnp.stack(hs), jnp.stack(cs)


if __name__ == "__main__":
    batch = 8
    size = 32           # model dim of buf/stack hidden states
    tracker_size = 32   # Tracker hidden size; gate dim = 4 * 32 = 128 lanes
    steps = 16          # number of fused Tracker.forward steps (steps*batch = 128 MXU rows)

    key = jax.random.PRNGKey(0)
    ks = jax.random.split(key, 8)

    params = {
        "w_buf": 0.1 * jax.random.normal(ks[0], (size, 4 * tracker_size), jnp.float32),
        "w_s1":  0.1 * jax.random.normal(ks[1], (size, 4 * tracker_size), jnp.float32),
        "w_s2":  0.1 * jax.random.normal(ks[2], (size, 4 * tracker_size), jnp.float32),
        "w_lat": 0.1 * jax.random.normal(ks[3], (tracker_size, 4 * tracker_size), jnp.float32),
        "b_lat": 0.01 * jax.random.normal(ks[4], (1, 4 * tracker_size), jnp.float32),
    }

    xb_seq = jax.random.normal(ks[5], (steps, batch, size), jnp.float32)
    xs1_seq = jax.random.normal(ks[6], (steps, batch, size), jnp.float32)
    xs2_seq = jax.random.normal(ks[7], (steps, batch, size), jnp.float32)

    packed = pack_tracker_params(params)
    h_seq, c_seq = tracker_unroll(packed, xb_seq, xs1_seq, xs2_seq)
    jax.block_until_ready((h_seq, c_seq))

    # Tight check against a reference using the same mixed precision as the kernel.
    rh_m, rc_m = _reference_unroll(params, xb_seq, xs1_seq, xs2_seq, mixed=True)
    assert jnp.allclose(h_seq, rh_m, atol=2e-3, rtol=2e-3), float(jnp.max(jnp.abs(h_seq - rh_m)))
    assert jnp.allclose(c_seq, rc_m, atol=2e-3, rtol=2e-3), float(jnp.max(jnp.abs(c_seq - rc_m)))

    # Loose sanity check against the exact f32 module semantics (bf16 MXU rounding only).
    rh_f, rc_f = _reference_unroll(params, xb_seq, xs1_seq, xs2_seq, mixed=False)
    assert float(jnp.max(jnp.abs(h_seq - rh_f))) < 0.15
    assert float(jnp.max(jnp.abs(c_seq - rc_f))) < 0.15

    print("KERNEL_OK")
</pallas_src>

<mosaic_0001>
module attributes {stable_mosaic.version = 11 : i64} {
  func.func @_tracker_fused_kernel(%arg0: i32, %arg1: memref<128x96xbf16, #tpu.memory_space<vmem>>, %arg2: memref<96x128xbf16, #tpu.memory_space<vmem>>, %arg3: memref<32x128xbf16, #tpu.memory_space<vmem>>, %arg4: memref<1x128xf32, #tpu.memory_space<vmem>>, %arg5: memref<2x8x512xf32, #tpu.memory_space<vmem>>, %arg6: memref<128x128xf32, #tpu.memory_space<vmem>>) attributes {dimension_semantics = [#tpu.dimension_semantics<arbitrary>], iteration_bounds = array<i64: 1>, scalar_prefetch = 0 : i64, scratch_operands = 1 : i64, tpu.core_type = #tpu.core_type<tc>, window_params = [{pipeline_mode = #tpu.pipeline_mode<synchronous>, transform_indices = @transform_0, window_bounds = array<i64: 128, 96>}, {pipeline_mode = #tpu.pipeline_mode<synchronous>, transform_indices = @transform_1, window_bounds = array<i64: 96, 128>}, {pipeline_mode = #tpu.pipeline_mode<synchronous>, transform_indices = @transform_2, window_bounds = array<i64: 32, 128>}, {pipeline_mode = #tpu.pipeline_mode<synchronous>, transform_indices = @transform_3, window_bounds = array<i64: 1, 128>}, {pipeline_mode = #tpu.pipeline_mode<synchronous>, transform_indices = @transform_4, window_bounds = array<i64: 2, 8, 512>}]} {
    %c0 = arith.constant 0 : index
    %c0_0 = arith.constant 0 : index
    %0 = vector.load %arg1[%c0, %c0_0] : memref<128x96xbf16, #tpu.memory_space<vmem>>, vector<128x96xbf16>
    %c0_1 = arith.constant 0 : index
    %c0_2 = arith.constant 0 : index
    %1 = vector.load %arg2[%c0_1, %c0_2] : memref<96x128xbf16, #tpu.memory_space<vmem>>, vector<96x128xbf16>
    %cst = arith.constant dense<0.000000e+00> : vector<128x128xf32>
    %2 = tpu.matmul %0, %1, %cst {dimension_numbers = #tpu.dot_dimension_numbers<[1], [0], [0], [1], [0, 0, 1, 1], [], []>} : vector<128x96xbf16>, vector<96x128xbf16>, vector<128x128xf32> -> vector<128x128xf32>
    %3 = tpu.iota {dimensions = array<i32: 0>} : vector<128x128xi32>
    %c8_i32 = arith.constant 8 : i32
    %4 = vector.broadcast %c8_i32 : i32 to vector<128x128xi32>
    %5 = arith.cmpi sge, %3, %4 : vector<128x128xi32>
    %cst_3 = arith.constant 1.000000e+00 : f32
    %cst_4 = arith.constant 0.000000e+00 : f32
    %6 = vector.broadcast %cst_3 : f32 to vector<128x128xf32>
    %7 = vector.broadcast %cst_4 : f32 to vector<128x128xf32>
    %8 = arith.select %5, %6, %7 : vector<128x128xi1>, vector<128x128xf32>
    %c0_5 = arith.constant 0 : index
    %c0_6 = arith.constant 0 : index
    %9 = vector.load %arg4[%c0_5, %c0_6] : memref<1x128xf32, #tpu.memory_space<vmem>>, vector<1x128xf32>
    %10 = vector.broadcast %9 : vector<1x128xf32> to vector<128x128xf32>
    %11 = arith.mulf %8, %10 : vector<128x128xf32>
    %12 = arith.addf %2, %11 : vector<128x128xf32>
    %c0_7 = arith.constant 0 : index
    %c0_8 = arith.constant 0 : index
    %13 = vector.load %arg6[%c0_7, %c0_8] : memref<128x128xf32, #tpu.memory_space<vmem>>, vector<128x128xf32>
    tpu.vector_store %arg6[%c0_7, %c0_8], %12 {strides = array<i32>} : memref<128x128xf32, #tpu.memory_space<vmem>>, vector<128x128xf32>,
    %cst_9 = arith.constant 0.000000e+00 : f32
    %14 = vector.broadcast %cst_9 : f32 to vector<8x32xf32>
    %c0_10 = arith.constant 0 : index
    %c0_11 = arith.constant 0 : index
    %15 = vector.load %arg6[%c0_10, %c0_11] : memref<128x128xf32, #tpu.memory_space<vmem>>, vector<8x128xf32>
    %16 = arith.negf %15 : vector<8x128xf32>
    %17 = math.exp %16 : vector<8x128xf32>
    %cst_12 = arith.constant 1.000000e+00 : f32
    %18 = vector.broadcast %cst_12 : f32 to vector<8x128xf32>
    %19 = arith.addf %18, %17 : vector<8x128xf32>
    %20 = arith.divf %18, %19 : vector<8x128xf32>
    %21 = vector.extract_strided_slice %15 {offsets = [0, 0], sizes = [8, 32], strides = [1, 1]} : vector<8x128xf32> to vector<8x32xf32>
    %22 = math.tanh %21 : vector<8x32xf32>
    %23 = vector.extract_strided_slice %20 {offsets = [0, 32], sizes = [8, 32], strides = [1, 1]} : vector<8x128xf32> to vector<8x32xf32>
    %24 = vector.extract_strided_slice %20 {offsets = [0, 64], sizes = [8, 32], strides = [1, 1]} : vector<8x128xf32> to vector<8x32xf32>
    %25 = vector.extract_strided_slice %20 {offsets = [0, 96], sizes = [8, 32], strides = [1, 1]} : vector<8x128xf32> to vector<8x32xf32>
    %26 = arith.mulf %22, %23 : vector<8x32xf32>
    %27 = arith.mulf %24, %14 : vector<8x32xf32>
    %28 = arith.addf %26, %27 : vector<8x32xf32>
    %29 = math.tanh %28 : vector<8x32xf32>
    %30 = arith.mulf %25, %29 : vector<8x32xf32>
    %31 = arith.truncf %30 : vector<8x32xf32> to vector<8x32xbf16>
    %c0_13 = arith.constant 0 : index
    %c0_14 = arith.constant 0 : index
    %c0_15 = arith.constant 0 : index
    %32 = vector.load %arg5[%c0_13, %c0_14, %c0_15] : memref<2x8x512xf32, #tpu.memory_space<vmem>>, vector<1x8x32xf32>
    %33 = vector.shape_cast %32 : vector<1x8x32xf32> to vector<8x32xf32>
    %34 = vector.shape_cast %30 : vector<8x32xf32> to vector<1x8x32xf32>
    tpu.vector_store %arg5[%c0_13, %c0_14, %c0_15], %34 {strides = array<i32>} : memref<2x8x512xf32, #tpu.memory_space<vmem>>, vector<1x8x32xf32>,
    %c1 = arith.constant 1 : index
    %c0_16 = arith.constant 0 : index
    %c0_17 = arith.constant 0 : index
    %35 = vector.load %arg5[%c1, %c0_16, %c0_17] : memref<2x8x512xf32, #tpu.memory_space<vmem>>, vector<1x8x32xf32>
    %36 = vector.shape_cast %35 : vector<1x8x32xf32> to vector<8x32xf32>
    %37 = vector.shape_cast %28 : vector<8x32xf32> to vector<1x8x32xf32>
    tpu.vector_store %arg5[%c1, %c0_16, %c0_17], %37 {strides = array<i32>} : memref<2x8x512xf32, #tpu.memory_space<vmem>>, vector<1x8x32xf32>,
    %c8 = arith.constant 8 : index
    %c0_18 = arith.constant 0 : index
    %38 = vector.load %arg6[%c8, %c0_18] : memref<128x128xf32, #tpu.memory_space<vmem>>, vector<8x128xf32>
    %c0_19 = arith.constant 0 : index
    %c0_20 = arith.constant 0 : index
    %39 = vector.load %arg3[%c0_19, %c0_20] : memref<32x128xbf16, #tpu.memory_space<vmem>>, vector<32x128xbf16>
    %cst_21 = arith.constant dense<0.000000e+00> : vector<8x128xf32>
    %40 = tpu.matmul %31, %39, %cst_21 {dimension_numbers = #tpu.dot_dimension_numbers<[1], [0], [0], [1], [0, 0, 1, 1], [], []>} : vector<8x32xbf16>, vector<32x128xbf16>, vector<8x128xf32> -> vector<8x128xf32>
    %41 = arith.addf %38, %40 : vector<8x128xf32>
    %42 = arith.negf %41 : vector<8x128xf32>
    %43 = math.exp %42 : vector<8x128xf32>
    %cst_22 = arith.constant 1.000000e+00 : f32
    %44 = vector.broadcast %cst_22 : f32 to vector<8x128xf32>
    %45 = arith.addf %44, %43 : vector<8x128xf32>
    %46 = arith.divf %44, %45 : vector<8x128xf32>
    %47 = vector.extract_strided_slice %41 {offsets = [0, 0], sizes = [8, 32], strides = [1, 1]} : vector<8x128xf32> to vector<8x32xf32>
    %48 = math.tanh %47 : vector<8x32xf32>
    %49 = vector.extract_strided_slice %46 {offsets = [0, 32], sizes = [8, 32], strides = [1, 1]} : vector<8x128xf32> to vector<8x32xf32>
    %50 = vector.extract_strided_slice %46 {offsets = [0, 64], sizes = [8, 32], strides = [1, 1]} : vector<8x128xf32> to vector<8x32xf32>
    %51 = vector.extract_strided_slice %46 {offsets = [0, 96], sizes = [8, 32], strides = [1, 1]} : vector<8x128xf32> to vector<8x32xf32>
    %52 = arith.mulf %48, %49 : vector<8x32xf32>
    %53 = arith.mulf %50, %28 : vector<8x32xf32>
    %54 = arith.addf %52, %53 : vector<8x32xf32>
    %55 = math.tanh %54 : vector<8x32xf32>
    %56 = arith.mulf %51, %55 : vector<8x32xf32>
    %57 = arith.truncf %56 : vector<8x32xf32> to vector<8x32xbf16>
    %c0_23 = arith.constant 0 : index
    %c0_24 = arith.constant 0 : index
    %c32 = arith.constant 32 : index
    %58 = vector.load %arg5[%c0_23, %c0_24, %c32] : memref<2x8x512xf32, #tpu.memory_space<vmem>>, vector<1x8x32xf32>
    %59 = vector.shape_cast %58 : vector<1x8x32xf32> to vector<8x32xf32>
    %60 = vector.shape_cast %56 : vector<8x32xf32> to vector<1x8x32xf32>
    tpu.vector_store %arg5[%c0_23, %c0_24, %c32], %60 {strides = array<i32>} : memref<2x8x512xf32, #tpu.memory_space<vmem>>, vector<1x8x32xf32>,
    %c1_25 = arith.constant 1 : index
    %c0_26 = arith.constant 0 : index
    %c32_27 = arith.constant 32 : index
    %61 = vector.load %arg5[%c1_25, %c0_26, %c32_27] : memref<2x8x512xf32, #tpu.memory_space<vmem>>, vector<1x8x32xf32>
    %62 = vector.shape_cast %61 : vector<1x8x32xf32> to vector<8x32xf32>
    %63 = vector.shape_cast %54 : vector<8x32xf32> to vector<1x8x32xf32>
    tpu.vector_store %arg5[%c1_25, %c0_26, %c32_27], %63 {strides = array<i32>} : memref<2x8x512xf32, #tpu.memory_space<vmem>>, vector<1x8x32xf32>,
    %c16 = arith.constant 16 : index
    %c0_28 = arith.constant 0 : index
    %64 = vector.load %arg6[%c16, %c0_28] : memref<128x128xf32, #tpu.memory_space<vmem>>, vector<8x128xf32>
    %c0_29 = arith.constant 0 : index
    %c0_30 = arith.constant 0 : index
    %65 = vector.load %arg3[%c0_29, %c0_30] : memref<32x128xbf16, #tpu.memory_space<vmem>>, vector<32x128xbf16>
    %cst_31 = arith.constant dense<0.000000e+00> : vector<8x128xf32>
    %66 = tpu.matmul %57, %65, %cst_31 {dimension_numbers = #tpu.dot_dimension_numbers<[1], [0], [0], [1], [0, 0, 1, 1], [], []>} : vector<8x32xbf16>, vector<32x128xbf16>, vector<8x128xf32> -> vector<8x128xf32>
    %67 = arith.addf %64, %66 : vector<8x128xf32>
    %68 = arith.negf %67 : vector<8x128xf32>
    %69 = math.exp %68 : vector<8x128xf32>
    %cst_32 = arith.constant 1.000000e+00 : f32
    %70 = vector.broadcast %cst_32 : f32 to vector<8x128xf32>
    %71 = arith.addf %70, %69 : vector<8x128xf32>
    %72 = arith.divf %70, %71 : vector<8x128xf32>
    %73 = vector.extract_strided_slice %67 {offsets = [0, 0], sizes = [8, 32], strides = [1, 1]} : vector<8x128xf32> to vector<8x32xf32>
    %74 = math.tanh %73 : vector<8x32xf32>
    %75 = vector.extract_strided_slice %72 {offsets = [0, 32], sizes = [8, 32], strides = [1, 1]} : vector<8x128xf32> to vector<8x32xf32>
    %76 = vector.extract_strided_slice %72 {offsets = [0, 64], sizes = [8, 32], strides = [1, 1]} : vector<8x128xf32> to vector<8x32xf32>
    %77 = vector.extract_strided_slice %72 {offsets = [0, 96], sizes = [8, 32], strides = [1, 1]} : vector<8x128xf32> to vector<8x32xf32>
    %78 = arith.mulf %74, %75 : vector<8x32xf32>
    %79 = arith.mulf %76, %54 : vector<8x32xf32>
    %80 = arith.addf %78, %79 : vector<8x32xf32>
    %81 = math.tanh %80 : vector<8x32xf32>
    %82 = arith.mulf %77, %81 : vector<8x32xf32>
    %83 = arith.truncf %82 : vector<8x32xf32> to vector<8x32xbf16>
    %c0_33 = arith.constant 0 : index
    %c0_34 = arith.constant 0 : index
    %c64 = arith.constant 64 : index
    %84 = vector.load %arg5[%c0_33, %c0_34, %c64] : memref<2x8x512xf32, #tpu.memory_space<vmem>>, vector<1x8x32xf32>
    %85 = vector.shape_cast %84 : vector<1x8x32xf32> to vector<8x32xf32>
    %86 = vector.shape_cast %82 : vector<8x32xf32> to vector<1x8x32xf32>
    tpu.vector_store %arg5[%c0_33, %c0_34, %c64], %86 {strides = array<i32>} : memref<2x8x512xf32, #tpu.memory_space<vmem>>, vector<1x8x32xf32>,
    %c1_35 = arith.constant 1 : index
    %c0_36 = arith.constant 0 : index
    %c64_37 = arith.constant 64 : index
    %87 = vector.load %arg5[%c1_35, %c0_36, %c64_37] : memref<2x8x512xf32, #tpu.memory_space<vmem>>, vector<1x8x32xf32>
    %88 = vector.shape_cast %87 : vector<1x8x32xf32> to vector<8x32xf32>
    %89 = vector.shape_cast %80 : vector<8x32xf32> to vector<1x8x32xf32>
    tpu.vector_store %arg5[%c1_35, %c0_36, %c64_37], %89 {strides = array<i32>} : memref<2x8x512xf32, #tpu.memory_space<vmem>>, vector<1x8x32xf32>,
    %c24 = arith.constant 24 : index
    %c0_38 = arith.constant 0 : index
    %90 = vector.load %arg6[%c24, %c0_38] : memref<128x128xf32, #tpu.memory_space<vmem>>, vector<8x128xf32>
    %c0_39 = arith.constant 0 : index
    %c0_40 = arith.constant 0 : index
    %91 = vector.load %arg3[%c0_39, %c0_40] : memref<32x128xbf16, #tpu.memory_space<vmem>>, vector<32x128xbf16>
    %cst_41 = arith.constant dense<0.000000e+00> : vector<8x128xf32>
    %92 = tpu.matmul %83, %91, %cst_41 {dimension_numbers = #tpu.dot_dimension_numbers<[1], [0], [0], [1], [0, 0, 1, 1], [], []>} : vector<8x32xbf16>, vector<32x128xbf16>, vector<8x128xf32> -> vector<8x128xf32>
    %93 = arith.addf %90, %92 : vector<8x128xf32>
    %94 = arith.negf %93 : vector<8x128xf32>
    %95 = math.exp %94 : vector<8x128xf32>
    %cst_42 = arith.constant 1.000000e+00 : f32
    %96 = vector.broadcast %cst_42 : f32 to vector<8x128xf32>
    %97 = arith.addf %96, %95 : vector<8x128xf32>
    %98 = arith.divf %96, %97 : vector<8x128xf32>
    %99 = vector.extract_strided_slice %93 {offsets = [0, 0], sizes = [8, 32], strides = [1, 1]} : vector<8x128xf32> to vector<8x32xf32>
    %100 = math.tanh %99 : vector<8x32xf32>
    %101 = vector.extract_strided_slice %98 {offsets = [0, 32], sizes = [8, 32], strides = [1, 1]} : vector<8x128xf32> to vector<8x32xf32>
    %102 = vector.extract_strided_slice %98 {offsets = [0, 64], sizes = [8, 32], strides = [1, 1]} : vector<8x128xf32> to vector<8x32xf32>
    %103 = vector.extract_strided_slice %98 {offsets = [0, 96], sizes = [8, 32], strides = [1, 1]} : vector<8x128xf32> to vector<8x32xf32>
    %104 = arith.mulf %100, %101 : vector<8x32xf32>
    %105 = arith.mulf %102, %80 : vector<8x32xf32>
    %106 = arith.addf %104, %105 : vector<8x32xf32>
    %107 = math.tanh %106 : vector<8x32xf32>
    %108 = arith.mulf %103, %107 : vector<8x32xf32>
    %109 = arith.truncf %108 : vector<8x32xf32> to vector<8x32xbf16>
    %c0_43 = arith.constant 0 : index
    %c0_44 = arith.constant 0 : index
    %c96 = arith.constant 96 : index
    %110 = vector.load %arg5[%c0_43, %c0_44, %c96] : memref<2x8x512xf32, #tpu.memory_space<vmem>>, vector<1x8x32xf32>
    %111 = vector.shape_cast %110 : vector<1x8x32xf32> to vector<8x32xf32>
    %112 = vector.shape_cast %108 : vector<8x32xf32> to vector<1x8x32xf32>
    tpu.vector_store %arg5[%c0_43, %c0_44, %c96], %112 {strides = array<i32>} : memref<2x8x512xf32, #tpu.memory_space<vmem>>, vector<1x8x32xf32>,
    %c1_45 = arith.constant 1 : index
    %c0_46 = arith.constant 0 : index
    %c96_47 = arith.constant 96 : index
    %113 = vector.load %arg5[%c1_45, %c0_46, %c96_47] : memref<2x8x512xf32, #tpu.memory_space<vmem>>, vector<1x8x32xf32>
    %114 = vector.shape_cast %113 : vector<1x8x32xf32> to vector<8x32xf32>
    %115 = vector.shape_cast %106 : vector<8x32xf32> to vector<1x8x32xf32>
    tpu.vector_store %arg5[%c1_45, %c0_46, %c96_47], %115 {strides = array<i32>} : memref<2x8x512xf32, #tpu.memory_space<vmem>>, vector<1x8x32xf32>,
    %c32_48 = arith.constant 32 : index
    %c0_49 = arith.constant 0 : index
    %116 = vector.load %arg6[%c32_48, %c0_49] : memref<128x128xf32, #tpu.memory_space<vmem>>, vector<8x128xf32>
    %c0_50 = arith.constant 0 : index
    %c0_51 = arith.constant 0 : index
    %117 = vector.load %arg3[%c0_50, %c0_51] : memref<32x128xbf16, #tpu.memory_space<vmem>>, vector<32x128xbf16>
    %cst_52 = arith.constant dense<0.000000e+00> : vector<8x128xf32>
    %118 = tpu.matmul %109, %117, %cst_52 {dimension_numbers = #tpu.dot_dimension_numbers<[1], [0], [0], [1], [0, 0, 1, 1], [], []>} : vector<8x32xbf16>, vector<32x128xbf16>, vector<8x128xf32> -> vector<8x128xf32>
    %119 = arith.addf %116, %118 : vector<8x128xf32>
    %120 = arith.negf %119 : vector<8x128xf32>
    %121 = math.exp %120 : vector<8x128xf32>
    %cst_53 = arith.constant 1.000000e+00 : f32
    %122 = vector.broadcast %cst_53 : f32 to vector<8x128xf32>
    %123 = arith.addf %122, %121 : vector<8x128xf32>
    %124 = arith.divf %122, %123 : vector<8x128xf32>
    %125 = vector.extract_strided_slice %119 {offsets = [0, 0], sizes = [8, 32], strides = [1, 1]} : vector<8x128xf32> to vector<8x32xf32>
    %126 = math.tanh %125 : vector<8x32xf32>
    %127 = vector.extract_strided_slice %124 {offsets = [0, 32], sizes = [8, 32], strides = [1, 1]} : vector<8x128xf32> to vector<8x32xf32>
    %128 = vector.extract_strided_slice %124 {offsets = [0, 64], sizes = [8, 32], strides = [1, 1]} : vector<8x128xf32> to vector<8x32xf32>
    %129 = vector.extract_strided_slice %124 {offsets = [0, 96], sizes = [8, 32], strides = [1, 1]} : vector<8x128xf32> to vector<8x32xf32>
    %130 = arith.mulf %126, %127 : vector<8x32xf32>
    %131 = arith.mulf %128, %106 : vector<8x32xf32>
    %132 = arith.addf %130, %131 : vector<8x32xf32>
    %133 = math.tanh %132 : vector<8x32xf32>
    %134 = arith.mulf %129, %133 : vector<8x32xf32>
    %135 = arith.truncf %134 : vector<8x32xf32> to vector<8x32xbf16>
    %c0_54 = arith.constant 0 : index
    %c0_55 = arith.constant 0 : index
    %c128 = arith.constant 128 : index
    %136 = vector.load %arg5[%c0_54, %c0_55, %c128] : memref<2x8x512xf32, #tpu.memory_space<vmem>>, vector<1x8x32xf32>
    %137 = vector.shape_cast %136 : vector<1x8x32xf32> to vector<8x32xf32>
    %138 = vector.shape_cast %134 : vector<8x32xf32> to vector<1x8x32xf32>
    tpu.vector_store %arg5[%c0_54, %c0_55, %c128], %138 {strides = array<i32>} : memref<2x8x512xf32, #tpu.memory_space<vmem>>, vector<1x8x32xf32>,
    %c1_56 = arith.constant 1 : index
    %c0_57 = arith.constant 0 : index
    %c128_58 = arith.constant 128 : index
    %139 = vector.load %arg5[%c1_56, %c0_57, %c128_58] : memref<2x8x512xf32, #tpu.memory_space<vmem>>, vector<1x8x32xf32>
    %140 = vector.shape_cast %139 : vector<1x8x32xf32> to vector<8x32xf32>
    %141 = vector.shape_cast %132 : vector<8x32xf32> to vector<1x8x32xf32>
    tpu.vector_store %arg5[%c1_56, %c0_57, %c128_58], %141 {strides = array<i32>} : memref<2x8x512xf32, #tpu.memory_space<vmem>>, vector<1x8x32xf32>,
    %c40 = arith.constant 40 : index
    %c0_59 = arith.constant 0 : index
    %142 = vector.load %arg6[%c40, %c0_59] : memref<128x128xf32, #tpu.memory_space<vmem>>, vector<8x128xf32>
    %c0_60 = arith.constant 0 : index
    %c0_61 = arith.constant 0 : index
    %143 = vector.load %arg3[%c0_60, %c0_61] : memref<32x128xbf16, #tpu.memory_space<vmem>>, vector<32x128xbf16>
    %cst_62 = arith.constant dense<0.000000e+00> : vector<8x128xf32>
    %144 = tpu.matmul %135, %143, %cst_62 {dimension_numbers = #tpu.dot_dimension_numbers<[1], [0], [0], [1], [0, 0, 1, 1], [], []>} : vector<8x32xbf16>, vector<32x128xbf16>, vector<8x128xf32> -> vector<8x128xf32>
    %145 = arith.addf %142, %144 : vector<8x128xf32>
    %146 = arith.negf %145 : vector<8x128xf32>
    %147 = math.exp %146 : vector<8x128xf32>
    %cst_63 = arith.constant 1.000000e+00 : f32
    %148 = vector.broadcast %cst_63 : f32 to vector<8x128xf32>
    %149 = arith.addf %148, %147 : vector<8x128xf32>
    %150 = arith.divf %148, %149 : vector<8x128xf32>
    %151 = vector.extract_strided_slice %145 {offsets = [0, 0], sizes = [8, 32], strides = [1, 1]} : vector<8x128xf32> to vector<8x32xf32>
    %152 = math.tanh %151 : vector<8x32xf32>
    %153 = vector.extract_strided_slice %150 {offsets = [0, 32], sizes = [8, 32], strides = [1, 1]} : vector<8x128xf32> to vector<8x32xf32>
    %154 = vector.extract_strided_slice %150 {offsets = [0, 64], sizes = [8, 32], strides = [1, 1]} : vector<8x128xf32> to vector<8x32xf32>
    %155 = vector.extract_strided_slice %150 {offsets = [0, 96], sizes = [8, 32], strides = [1, 1]} : vector<8x128xf32> to vector<8x32xf32>
    %156 = arith.mulf %152, %153 : vector<8x32xf32>
    %157 = arith.mulf %154, %132 : vector<8x32xf32>
    %158 = arith.addf %156, %157 : vector<8x32xf32>
    %159 = math.tanh %158 : vector<8x32xf32>
    %160 = arith.mulf %155, %159 : vector<8x32xf32>
    %161 = arith.truncf %160 : vector<8x32xf32> to vector<8x32xbf16>
    %c0_64 = arith.constant 0 : index
    %c0_65 = arith.constant 0 : index
    %c160 = arith.constant 160 : index
    %162 = vector.load %arg5[%c0_64, %c0_65, %c160] : memref<2x8x512xf32, #tpu.memory_space<vmem>>, vector<1x8x32xf32>
    %163 = vector.shape_cast %162 : vector<1x8x32xf32> to vector<8x32xf32>
    %164 = vector.shape_cast %160 : vector<8x32xf32> to vector<1x8x32xf32>
    tpu.vector_store %arg5[%c0_64, %c0_65, %c160], %164 {strides = array<i32>} : memref<2x8x512xf32, #tpu.memory_space<vmem>>, vector<1x8x32xf32>,
    %c1_66 = arith.constant 1 : index
    %c0_67 = arith.constant 0 : index
    %c160_68 = arith.constant 160 : index
    %165 = vector.load %arg5[%c1_66, %c0_67, %c160_68] : memref<2x8x512xf32, #tpu.memory_space<vmem>>, vector<1x8x32xf32>
    %166 = vector.shape_cast %165 : vector<1x8x32xf32> to vector<8x32xf32>
    %167 = vector.shape_cast %158 : vector<8x32xf32> to vector<1x8x32xf32>
    tpu.vector_store %arg5[%c1_66, %c0_67, %c160_68], %167 {strides = array<i32>} : memref<2x8x512xf32, #tpu.memory_space<vmem>>, vector<1x8x32xf32>,
    %c48 = arith.constant 48 : index
    %c0_69 = arith.constant 0 : index
    %168 = vector.load %arg6[%c48, %c0_69] : memref<128x128xf32, #tpu.memory_space<vmem>>, vector<8x128xf32>
    %c0_70 = arith.constant 0 : index
    %c0_71 = arith.constant 0 : index
    %169 = vector.load %arg3[%c0_70, %c0_71] : memref<32x128xbf16, #tpu.memory_space<vmem>>, vector<32x128xbf16>
    %cst_72 = arith.constant dense<0.000000e+00> : vector<8x128xf32>
    %170 = tpu.matmul %161, %169, %cst_72 {dimension_numbers = #tpu.dot_dimension_numbers<[1], [0], [0], [1], [0, 0, 1, 1], [], []>} : vector<8x32xbf16>, vector<32x128xbf16>, vector<8x128xf32> -> vector<8x128xf32>
    %171 = arith.addf %168, %170 : vector<8x128xf32>
    %172 = arith.negf %171 : vector<8x128xf32>
    %173 = math.exp %172 : vector<8x128xf32>
    %cst_73 = arith.constant 1.000000e+00 : f32
    %174 = vector.broadcast %cst_73 : f32 to vector<8x128xf32>
    %175 = arith.addf %174, %173 : vector<8x128xf32>
    %176 = arith.divf %174, %175 : vector<8x128xf32>
    %177 = vector.extract_strided_slice %171 {offsets = [0, 0], sizes = [8, 32], strides = [1, 1]} : vector<8x128xf32> to vector<8x32xf32>
    %178 = math.tanh %177 : vector<8x32xf32>
    %179 = vector.extract_strided_slice %176 {offsets = [0, 32], sizes = [8, 32], strides = [1, 1]} : vector<8x128xf32> to vector<8x32xf32>
    %180 = vector.extract_strided_slice %176 {offsets = [0, 64], sizes = [8, 32], strides = [1, 1]} : vector<8x128xf32> to vector<8x32xf32>
    %181 = vector.extract_strided_slice %176 {offsets = [0, 96], sizes = [8, 32], strides = [1, 1]} : vector<8x128xf32> to vector<8x32xf32>
    %182 = arith.mulf %178, %179 : vector<8x32xf32>
    %183 = arith.mulf %180, %158 : vector<8x32xf32>
    %184 = arith.addf %182, %183 : vector<8x32xf32>
    %185 = math.tanh %184 : vector<8x32xf32>
    %186 = arith.mulf %181, %185 : vector<8x32xf32>
    %187 = arith.truncf %186 : vector<8x32xf32> to vector<8x32xbf16>
    %c0_74 = arith.constant 0 : index
    %c0_75 = arith.constant 0 : index
    %c192 = arith.constant 192 : index
    %188 = vector.load %arg5[%c0_74, %c0_75, %c192] : memref<2x8x512xf32, #tpu.memory_space<vmem>>, vector<1x8x32xf32>
    %189 = vector.shape_cast %188 : vector<1x8x32xf32> to vector<8x32xf32>
    %190 = vector.shape_cast %186 : vector<8x32xf32> to vector<1x8x32xf32>
    tpu.vector_store %arg5[%c0_74, %c0_75, %c192], %190 {strides = array<i32>} : memref<2x8x512xf32, #tpu.memory_space<vmem>>, vector<1x8x32xf32>,
    %c1_76 = arith.constant 1 : index
    %c0_77 = arith.constant 0 : index
    %c192_78 = arith.constant 192 : index
    %191 = vector.load %arg5[%c1_76, %c0_77, %c192_78] : memref<2x8x512xf32, #tpu.memory_space<vmem>>, vector<1x8x32xf32>
    %192 = vector.shape_cast %191 : vector<1x8x32xf32> to vector<8x32xf32>
    %193 = vector.shape_cast %184 : vector<8x32xf32> to vector<1x8x32xf32>
    tpu.vector_store %arg5[%c1_76, %c0_77, %c192_78], %193 {strides = array<i32>} : memref<2x8x512xf32, #tpu.memory_space<vmem>>, vector<1x8x32xf32>,
    %c56 = arith.constant 56 : index
    %c0_79 = arith.constant 0 : index
    %194 = vector.load %arg6[%c56, %c0_79] : memref<128x128xf32, #tpu.memory_space<vmem>>, vector<8x128xf32>
    %c0_80 = arith.constant 0 : index
    %c0_81 = arith.constant 0 : index
    %195 = vector.load %arg3[%c0_80, %c0_81] : memref<32x128xbf16, #tpu.memory_space<vmem>>, vector<32x128xbf16>
    %cst_82 = arith.constant dense<0.000000e+00> : vector<8x128xf32>
    %196 = tpu.matmul %187, %195, %cst_82 {dimension_numbers = #tpu.dot_dimension_numbers<[1], [0], [0], [1], [0, 0, 1, 1], [], []>} : vector<8x32xbf16>, vector<32x128xbf16>, vector<8x128xf32> -> vector<8x128xf32>
    %197 = arith.addf %194, %196 : vector<8x128xf32>
    %198 = arith.negf %197 : vector<8x128xf32>
    %199 = math.exp %198 : vector<8x128xf32>
    %cst_83 = arith.constant 1.000000e+00 : f32
    %200 = vector.broadcast %cst_83 : f32 to vector<8x128xf32>
    %201 = arith.addf %200, %199 : vector<8x128xf32>
    %202 = arith.divf %200, %201 : vector<8x128xf32>
    %203 = vector.extract_strided_slice %197 {offsets = [0, 0], sizes = [8, 32], strides = [1, 1]} : vector<8x128xf32> to vector<8x32xf32>
    %204 = math.tanh %203 : vector<8x32xf32>
    %205 = vector.extract_strided_slice %202 {offsets = [0, 32], sizes = [8, 32], strides = [1, 1]} : vector<8x128xf32> to vector<8x32xf32>
    %206 = vector.extract_strided_slice %202 {offsets = [0, 64], sizes = [8, 32], strides = [1, 1]} : vector<8x128xf32> to vector<8x32xf32>
    %207 = vector.extract_strided_slice %202 {offsets = [0, 96], sizes = [8, 32], strides = [1, 1]} : vector<8x128xf32> to vector<8x32xf32>
    %208 = arith.mulf %204, %205 : vector<8x32xf32>
    %209 = arith.mulf %206, %184 : vector<8x32xf32>
    %210 = arith.addf %208, %209 : vector<8x32xf32>
    %211 = math.tanh %210 : vector<8x32xf32>
    %212 = arith.mulf %207, %211 : vector<8x32xf32>
    %213 = arith.truncf %212 : vector<8x32xf32> to vector<8x32xbf16>
    %c0_84 = arith.constant 0 : index
    %c0_85 = arith.constant 0 : index
    %c224 = arith.constant 224 : index
    %214 = vector.load %arg5[%c0_84, %c0_85, %c224] : memref<2x8x512xf32, #tpu.memory_space<vmem>>, vector<1x8x32xf32>
    %215 = vector.shape_cast %214 : vector<1x8x32xf32> to vector<8x32xf32>
    %216 = vector.shape_cast %212 : vector<8x32xf32> to vector<1x8x32xf32>
    tpu.vector_store %arg5[%c0_84, %c0_85, %c224], %216 {strides = array<i32>} : memref<2x8x512xf32, #tpu.memory_space<vmem>>, vector<1x8x32xf32>,
    %c1_86 = arith.constant 1 : index
    %c0_87 = arith.constant 0 : index
    %c224_88 = arith.constant 224 : index
    %217 = vector.load %arg5[%c1_86, %c0_87, %c224_88] : memref<2x8x512xf32, #tpu.memory_space<vmem>>, vector<1x8x32xf32>
    %218 = vector.shape_cast %217 : vector<1x8x32xf32> to vector<8x32xf32>
    %219 = vector.shape_cast %210 : vector<8x32xf32> to vector<1x8x32xf32>
    tpu.vector_store %arg5[%c1_86, %c0_87, %c224_88], %219 {strides = array<i32>} : memref<2x8x512xf32, #tpu.memory_space<vmem>>, vector<1x8x32xf32>,
    %c64_89 = arith.constant 64 : index
    %c0_90 = arith.constant 0 : index
    %220 = vector.load %arg6[%c64_89, %c0_90] : memref<128x128xf32, #tpu.memory_space<vmem>>, vector<8x128xf32>
    %c0_91 = arith.constant 0 : index
    %c0_92 = arith.constant 0 : index
    %221 = vector.load %arg3[%c0_91, %c0_92] : memref<32x128xbf16, #tpu.memory_space<vmem>>, vector<32x128xbf16>
    %cst_93 = arith.constant dense<0.000000e+00> : vector<8x128xf32>
    %222 = tpu.matmul %213, %221, %cst_93 {dimension_numbers = #tpu.dot_dimension_numbers<[1], [0], [0], [1], [0, 0, 1, 1], [], []>} : vector<8x32xbf16>, vector<32x128xbf16>, vector<8x128xf32> -> vector<8x128xf32>
    %223 = arith.addf %220, %222 : vector<8x128xf32>
    %224 = arith.negf %223 : vector<8x128xf32>
    %225 = math.exp %224 : vector<8x128xf32>
    %cst_94 = arith.constant 1.000000e+00 : f32
    %226 = vector.broadcast %cst_94 : f32 to vector<8x128xf32>
    %227 = arith.addf %226, %225 : vector<8x128xf32>
    %228 = arith.divf %226, %227 : vector<8x128xf32>
    %229 = vector.extract_strided_slice %223 {offsets = [0, 0], sizes = [8, 32], strides = [1, 1]} : vector<8x128xf32> to vector<8x32xf32>
    %230 = math.tanh %229 : vector<8x32xf32>
    %231 = vector.extract_strided_slice %228 {offsets = [0, 32], sizes = [8, 32], strides = [1, 1]} : vector<8x128xf32> to vector<8x32xf32>
    %232 = vector.extract_strided_slice %228 {offsets = [0, 64], sizes = [8, 32], strides = [1, 1]} : vector<8x128xf32> to vector<8x32xf32>
    %233 = vector.extract_strided_slice %228 {offsets = [0, 96], sizes = [8, 32], strides = [1, 1]} : vector<8x128xf32> to vector<8x32xf32>
    %234 = arith.mulf %230, %231 : vector<8x32xf32>
    %235 = arith.mulf %232, %210 : vector<8x32xf32>
    %236 = arith.addf %234, %235 : vector<8x32xf32>
    %237 = math.tanh %236 : vector<8x32xf32>
    %238 = arith.mulf %233, %237 : vector<8x32xf32>
    %239 = arith.truncf %238 : vector<8x32xf32> to vector<8x32xbf16>
    %c0_95 = arith.constant 0 : index
    %c0_96 = arith.constant 0 : index
    %c256 = arith.constant 256 : index
    %240 = vector.load %arg5[%c0_95, %c0_96, %c256] : memref<2x8x512xf32, #tpu.memory_space<vmem>>, vector<1x8x32xf32>
    %241 = vector.shape_cast %240 : vector<1x8x32xf32> to vector<8x32xf32>
    %242 = vector.shape_cast %238 : vector<8x32xf32> to vector<1x8x32xf32>
    tpu.vector_store %arg5[%c0_95, %c0_96, %c256], %242 {strides = array<i32>} : memref<2x8x512xf32, #tpu.memory_space<vmem>>, vector<1x8x32xf32>,
    %c1_97 = arith.constant 1 : index
    %c0_98 = arith.constant 0 : index
    %c256_99 = arith.constant 256 : index
    %243 = vector.load %arg5[%c1_97, %c0_98, %c256_99] : memref<2x8x512xf32, #tpu.memory_space<vmem>>, vector<1x8x32xf32>
    %244 = vector.shape_cast %243 : vector<1x8x32xf32> to vector<8x32xf32>
    %245 = vector.shape_cast %236 : vector<8x32xf32> to vector<1x8x32xf32>
    tpu.vector_store %arg5[%c1_97, %c0_98, %c256_99], %245 {strides = array<i32>} : memref<2x8x512xf32, #tpu.memory_space<vmem>>, vector<1x8x32xf32>,
    %c72 = arith.constant 72 : index
    %c0_100 = arith.constant 0 : index
    %246 = vector.load %arg6[%c72, %c0_100] : memref<128x128xf32, #tpu.memory_space<vmem>>, vector<8x128xf32>
    %c0_101 = arith.constant 0 : index
    %c0_102 = arith.constant 0 : index
    %247 = vector.load %arg3[%c0_101, %c0_102] : memref<32x128xbf16, #tpu.memory_space<vmem>>, vector<32x128xbf16>
    %cst_103 = arith.constant dense<0.000000e+00> : vector<8x128xf32>
    %248 = tpu.matmul %239, %247, %cst_103 {dimension_numbers = #tpu.dot_dimension_numbers<[1], [0], [0], [1], [0, 0, 1, 1], [], []>} : vector<8x32xbf16>, vector<32x128xbf16>, vector<8x128xf32> -> vector<8x128xf32>
    %249 = arith.addf %246, %248 : vector<8x128xf32>
    %250 = arith.negf %249 : vector<8x128xf32>
    %251 = math.exp %250 : vector<8x128xf32>
    %cst_104 = arith.constant 1.000000e+00 : f32
    %252 = vector.broadcast %cst_104 : f32 to vector<8x128xf32>
    %253 = arith.addf %252, %251 : vector<8x128xf32>
    %254 = arith.divf %252, %253 : vector<8x128xf32>
    %255 = vector.extract_strided_slice %249 {offsets = [0, 0], sizes = [8, 32], strides = [1, 1]} : vector<8x128xf32> to vector<8x32xf32>
    %256 = math.tanh %255 : vector<8x32xf32>
    %257 = vector.extract_strided_slice %254 {offsets = [0, 32], sizes = [8, 32], strides = [1, 1]} : vector<8x128xf32> to vector<8x32xf32>
    %258 = vector.extract_strided_slice %254 {offsets = [0, 64], sizes = [8, 32], strides = [1, 1]} : vector<8x128xf32> to vector<8x32xf32>
    %259 = vector.extract_strided_slice %254 {offsets = [0, 96], sizes = [8, 32], strides = [1, 1]} : vector<8x128xf32> to vector<8x32xf32>
    %260 = arith.mulf %256, %257 : vector<8x32xf32>
    %261 = arith.mulf %258, %236 : vector<8x32xf32>
    %262 = arith.addf %260, %261 : vector<8x32xf32>
    %263 = math.tanh %262 : vector<8x32xf32>
    %264 = arith.mulf %259, %263 : vector<8x32xf32>
    %265 = arith.truncf %264 : vector<8x32xf32> to vector<8x32xbf16>
    %c0_105 = arith.constant 0 : index
    %c0_106 = arith.constant 0 : index
    %c288 = arith.constant 288 : index
    %266 = vector.load %arg5[%c0_105, %c0_106, %c288] : memref<2x8x512xf32, #tpu.memory_space<vmem>>, vector<1x8x32xf32>
    %267 = vector.shape_cast %266 : vector<1x8x32xf32> to vector<8x32xf32>
    %268 = vector.shape_cast %264 : vector<8x32xf32> to vector<1x8x32xf32>
    tpu.vector_store %arg5[%c0_105, %c0_106, %c288], %268 {strides = array<i32>} : memref<2x8x512xf32, #tpu.memory_space<vmem>>, vector<1x8x32xf32>,
    %c1_107 = arith.constant 1 : index
    %c0_108 = arith.constant 0 : index
    %c288_109 = arith.constant 288 : index
    %269 = vector.load %arg5[%c1_107, %c0_108, %c288_109] : memref<2x8x512xf32, #tpu.memory_space<vmem>>, vector<1x8x32xf32>
    %270 = vector.shape_cast %269 : vector<1x8x32xf32> to vector<8x32xf32>
    %271 = vector.shape_cast %262 : vector<8x32xf32> to vector<1x8x32xf32>
    tpu.vector_store %arg5[%c1_107, %c0_108, %c288_109], %271 {strides = array<i32>} : memref<2x8x512xf32, #tpu.memory_space<vmem>>, vector<1x8x32xf32>,
    %c80 = arith.constant 80 : index
    %c0_110 = arith.constant 0 : index
    %272 = vector.load %arg6[%c80, %c0_110] : memref<128x128xf32, #tpu.memory_space<vmem>>, vector<8x128xf32>
    %c0_111 = arith.constant 0 : index
    %c0_112 = arith.constant 0 : index
    %273 = vector.load %arg3[%c0_111, %c0_112] : memref<32x128xbf16, #tpu.memory_space<vmem>>, vector<32x128xbf16>
    %cst_113 = arith.constant dense<0.000000e+00> : vector<8x128xf32>
    %274 = tpu.matmul %265, %273, %cst_113 {dimension_numbers = #tpu.dot_dimension_numbers<[1], [0], [0], [1], [0, 0, 1, 1], [], []>} : vector<8x32xbf16>, vector<32x128xbf16>, vector<8x128xf32> -> vector<8x128xf32>
    %275 = arith.addf %272, %274 : vector<8x128xf32>
    %276 = arith.negf %275 : vector<8x128xf32>
    %277 = math.exp %276 : vector<8x128xf32>
    %cst_114 = arith.constant 1.000000e+00 : f32
    %278 = vector.broadcast %cst_114 : f32 to vector<8x128xf32>
    %279 = arith.addf %278, %277 : vector<8x128xf32>
    %280 = arith.divf %278, %279 : vector<8x128xf32>
    %281 = vector.extract_strided_slice %275 {offsets = [0, 0], sizes = [8, 32], strides = [1, 1]} : vector<8x128xf32> to vector<8x32xf32>
    %282 = math.tanh %281 : vector<8x32xf32>
    %283 = vector.extract_strided_slice %280 {offsets = [0, 32], sizes = [8, 32], strides = [1, 1]} : vector<8x128xf32> to vector<8x32xf32>
    %284 = vector.extract_strided_slice %280 {offsets = [0, 64], sizes = [8, 32], strides = [1, 1]} : vector<8x128xf32> to vector<8x32xf32>
    %285 = vector.extract_strided_slice %280 {offsets = [0, 96], sizes = [8, 32], strides = [1, 1]} : vector<8x128xf32> to vector<8x32xf32>
    %286 = arith.mulf %282, %283 : vector<8x32xf32>
    %287 = arith.mulf %284, %262 : vector<8x32xf32>
    %288 = arith.addf %286, %287 : vector<8x32xf32>
    %289 = math.tanh %288 : vector<8x32xf32>
    %290 = arith.mulf %285, %289 : vector<8x32xf32>
    %291 = arith.truncf %290 : vector<8x32xf32> to vector<8x32xbf16>
    %c0_115 = arith.constant 0 : index
    %c0_116 = arith.constant 0 : index
    %c320 = arith.constant 320 : index
    %292 = vector.load %arg5[%c0_115, %c0_116, %c320] : memref<2x8x512xf32, #tpu.memory_space<vmem>>, vector<1x8x32xf32>
    %293 = vector.shape_cast %292 : vector<1x8x32xf32> to vector<8x32xf32>
    %294 = vector.shape_cast %290 : vector<8x32xf32> to vector<1x8x32xf32>
    tpu.vector_store %arg5[%c0_115, %c0_116, %c320], %294 {strides = array<i32>} : memref<2x8x512xf32, #tpu.memory_space<vmem>>, vector<1x8x32xf32>,
    %c1_117 = arith.constant 1 : index
    %c0_118 = arith.constant 0 : index
    %c320_119 = arith.constant 320 : index
    %295 = vector.load %arg5[%c1_117, %c0_118, %c320_119] : memref<2x8x512xf32, #tpu.memory_space<vmem>>, vector<1x8x32xf32>
    %296 = vector.shape_cast %295 : vector<1x8x32xf32> to vector<8x32xf32>
    %297 = vector.shape_cast %288 : vector<8x32xf32> to vector<1x8x32xf32>
    tpu.vector_store %arg5[%c1_117, %c0_118, %c320_119], %297 {strides = array<i32>} : memref<2x8x512xf32, #tpu.memory_space<vmem>>, vector<1x8x32xf32>,
    %c88 = arith.constant 88 : index
    %c0_120 = arith.constant 0 : index
    %298 = vector.load %arg6[%c88, %c0_120] : memref<128x128xf32, #tpu.memory_space<vmem>>, vector<8x128xf32>
    %c0_121 = arith.constant 0 : index
    %c0_122 = arith.constant 0 : index
    %299 = vector.load %arg3[%c0_121, %c0_122] : memref<32x128xbf16, #tpu.memory_space<vmem>>, vector<32x128xbf16>
    %cst_123 = arith.constant dense<0.000000e+00> : vector<8x128xf32>
    %300 = tpu.matmul %291, %299, %cst_123 {dimension_numbers = #tpu.dot_dimension_numbers<[1], [0], [0], [1], [0, 0, 1, 1], [], []>} : vector<8x32xbf16>, vector<32x128xbf16>, vector<8x128xf32> -> vector<8x128xf32>
    %301 = arith.addf %298, %300 : vector<8x128xf32>
    %302 = arith.negf %301 : vector<8x128xf32>
    %303 = math.exp %302 : vector<8x128xf32>
    %cst_124 = arith.constant 1.000000e+00 : f32
    %304 = vector.broadcast %cst_124 : f32 to vector<8x128xf32>
    %305 = arith.addf %304, %303 : vector<8x128xf32>
    %306 = arith.divf %304, %305 : vector<8x128xf32>
    %307 = vector.extract_strided_slice %301 {offsets = [0, 0], sizes = [8, 32], strides = [1, 1]} : vector<8x128xf32> to vector<8x32xf32>
    %308 = math.tanh %307 : vector<8x32xf32>
    %309 = vector.extract_strided_slice %306 {offsets = [0, 32], sizes = [8, 32], strides = [1, 1]} : vector<8x128xf32> to vector<8x32xf32>
    %310 = vector.extract_strided_slice %306 {offsets = [0, 64], sizes = [8, 32], strides = [1, 1]} : vector<8x128xf32> to vector<8x32xf32>
    %311 = vector.extract_strided_slice %306 {offsets = [0, 96], sizes = [8, 32], strides = [1, 1]} : vector<8x128xf32> to vector<8x32xf32>
    %312 = arith.mulf %308, %309 : vector<8x32xf32>
    %313 = arith.mulf %310, %288 : vector<8x32xf32>
    %314 = arith.addf %312, %313 : vector<8x32xf32>
    %315 = math.tanh %314 : vector<8x32xf32>
    %316 = arith.mulf %311, %315 : vector<8x32xf32>
    %317 = arith.truncf %316 : vector<8x32xf32> to vector<8x32xbf16>
    %c0_125 = arith.constant 0 : index
    %c0_126 = arith.constant 0 : index
    %c352 = arith.constant 352 : index
    %318 = vector.load %arg5[%c0_125, %c0_126, %c352] : memref<2x8x512xf32, #tpu.memory_space<vmem>>, vector<1x8x32xf32>
    %319 = vector.shape_cast %318 : vector<1x8x32xf32> to vector<8x32xf32>
    %320 = vector.shape_cast %316 : vector<8x32xf32> to vector<1x8x32xf32>
    tpu.vector_store %arg5[%c0_125, %c0_126, %c352], %320 {strides = array<i32>} : memref<2x8x512xf32, #tpu.memory_space<vmem>>, vector<1x8x32xf32>,
    %c1_127 = arith.constant 1 : index
    %c0_128 = arith.constant 0 : index
    %c352_129 = arith.constant 352 : index
    %321 = vector.load %arg5[%c1_127, %c0_128, %c352_129] : memref<2x8x512xf32, #tpu.memory_space<vmem>>, vector<1x8x32xf32>
    %322 = vector.shape_cast %321 : vector<1x8x32xf32> to vector<8x32xf32>
    %323 = vector.shape_cast %314 : vector<8x32xf32> to vector<1x8x32xf32>
    tpu.vector_store %arg5[%c1_127, %c0_128, %c352_129], %323 {strides = array<i32>} : memref<2x8x512xf32, #tpu.memory_space<vmem>>, vector<1x8x32xf32>,
    %c96_130 = arith.constant 96 : index
    %c0_131 = arith.constant 0 : index
    %324 = vector.load %arg6[%c96_130, %c0_131] : memref<128x128xf32, #tpu.memory_space<vmem>>, vector<8x128xf32>
    %c0_132 = arith.constant 0 : index
    %c0_133 = arith.constant 0 : index
    %325 = vector.load %arg3[%c0_132, %c0_133] : memref<32x128xbf16, #tpu.memory_space<vmem>>, vector<32x128xbf16>
    %cst_134 = arith.constant dense<0.000000e+00> : vector<8x128xf32>
    %326 = tpu.matmul %317, %325, %cst_134 {dimension_numbers = #tpu.dot_dimension_numbers<[1], [0], [0], [1], [0, 0, 1, 1], [], []>} : vector<8x32xbf16>, vector<32x128xbf16>, vector<8x128xf32> -> vector<8x128xf32>
    %327 = arith.addf %324, %326 : vector<8x128xf32>
    %328 = arith.negf %327 : vector<8x128xf32>
    %329 = math.exp %328 : vector<8x128xf32>
    %cst_135 = arith.constant 1.000000e+00 : f32
    %330 = vector.broadcast %cst_135 : f32 to vector<8x128xf32>
    %331 = arith.addf %330, %329 : vector<8x128xf32>
    %332 = arith.divf %330, %331 : vector<8x128xf32>
    %333 = vector.extract_strided_slice %327 {offsets = [0, 0], sizes = [8, 32], strides = [1, 1]} : vector<8x128xf32> to vector<8x32xf32>
    %334 = math.tanh %333 : vector<8x32xf32>
    %335 = vector.extract_strided_slice %332 {offsets = [0, 32], sizes = [8, 32], strides = [1, 1]} : vector<8x128xf32> to vector<8x32xf32>
    %336 = vector.extract_strided_slice %332 {offsets = [0, 64], sizes = [8, 32], strides = [1, 1]} : vector<8x128xf32> to vector<8x32xf32>
    %337 = vector.extract_strided_slice %332 {offsets = [0, 96], sizes = [8, 32], strides = [1, 1]} : vector<8x128xf32> to vector<8x32xf32>
    %338 = arith.mulf %334, %335 : vector<8x32xf32>
    %339 = arith.mulf %336, %314 : vector<8x32xf32>
    %340 = arith.addf %338, %339 : vector<8x32xf32>
    %341 = math.tanh %340 : vector<8x32xf32>
    %342 = arith.mulf %337, %341 : vector<8x32xf32>
    %343 = arith.truncf %342 : vector<8x32xf32> to vector<8x32xbf16>
    %c0_136 = arith.constant 0 : index
    %c0_137 = arith.constant 0 : index
    %c384 = arith.constant 384 : index
    %344 = vector.load %arg5[%c0_136, %c0_137, %c384] : memref<2x8x512xf32, #tpu.memory_space<vmem>>, vector<1x8x32xf32>
    %345 = vector.shape_cast %344 : vector<1x8x32xf32> to vector<8x32xf32>
    %346 = vector.shape_cast %342 : vector<8x32xf32> to vector<1x8x32xf32>
    tpu.vector_store %arg5[%c0_136, %c0_137, %c384], %346 {strides = array<i32>} : memref<2x8x512xf32, #tpu.memory_space<vmem>>, vector<1x8x32xf32>,
    %c1_138 = arith.constant 1 : index
    %c0_139 = arith.constant 0 : index
    %c384_140 = arith.constant 384 : index
    %347 = vector.load %arg5[%c1_138, %c0_139, %c384_140] : memref<2x8x512xf32, #tpu.memory_space<vmem>>, vector<1x8x32xf32>
    %348 = vector.shape_cast %347 : vector<1x8x32xf32> to vector<8x32xf32>
    %349 = vector.shape_cast %340 : vector<8x32xf32> to vector<1x8x32xf32>
    tpu.vector_store %arg5[%c1_138, %c0_139, %c384_140], %349 {strides = array<i32>} : memref<2x8x512xf32, #tpu.memory_space<vmem>>, vector<1x8x32xf32>,
    %c104 = arith.constant 104 : index
    %c0_141 = arith.constant 0 : index
    %350 = vector.load %arg6[%c104, %c0_141] : memref<128x128xf32, #tpu.memory_space<vmem>>, vector<8x128xf32>
    %c0_142 = arith.constant 0 : index
    %c0_143 = arith.constant 0 : index
    %351 = vector.load %arg3[%c0_142, %c0_143] : memref<32x128xbf16, #tpu.memory_space<vmem>>, vector<32x128xbf16>
    %cst_144 = arith.constant dense<0.000000e+00> : vector<8x128xf32>
    %352 = tpu.matmul %343, %351, %cst_144 {dimension_numbers = #tpu.dot_dimension_numbers<[1], [0], [0], [1], [0, 0, 1, 1], [], []>} : vector<8x32xbf16>, vector<32x128xbf16>, vector<8x128xf32> -> vector<8x128xf32>
    %353 = arith.addf %350, %352 : vector<8x128xf32>
    %354 = arith.negf %353 : vector<8x128xf32>
    %355 = math.exp %354 : vector<8x128xf32>
    %cst_145 = arith.constant 1.000000e+00 : f32
    %356 = vector.broadcast %cst_145 : f32 to vector<8x128xf32>
    %357 = arith.addf %356, %355 : vector<8x128xf32>
    %358 = arith.divf %356, %357 : vector<8x128xf32>
    %359 = vector.extract_strided_slice %353 {offsets = [0, 0], sizes = [8, 32], strides = [1, 1]} : vector<8x128xf32> to vector<8x32xf32>
    %360 = math.tanh %359 : vector<8x32xf32>
    %361 = vector.extract_strided_slice %358 {offsets = [0, 32], sizes = [8, 32], strides = [1, 1]} : vector<8x128xf32> to vector<8x32xf32>
    %362 = vector.extract_strided_slice %358 {offsets = [0, 64], sizes = [8, 32], strides = [1, 1]} : vector<8x128xf32> to vector<8x32xf32>
    %363 = vector.extract_strided_slice %358 {offsets = [0, 96], sizes = [8, 32], strides = [1, 1]} : vector<8x128xf32> to vector<8x32xf32>
    %364 = arith.mulf %360, %361 : vector<8x32xf32>
    %365 = arith.mulf %362, %340 : vector<8x32xf32>
    %366 = arith.addf %364, %365 : vector<8x32xf32>
    %367 = math.tanh %366 : vector<8x32xf32>
    %368 = arith.mulf %363, %367 : vector<8x32xf32>
    %369 = arith.truncf %368 : vector<8x32xf32> to vector<8x32xbf16>
    %c0_146 = arith.constant 0 : index
    %c0_147 = arith.constant 0 : index
    %c416 = arith.constant 416 : index
    %370 = vector.load %arg5[%c0_146, %c0_147, %c416] : memref<2x8x512xf32, #tpu.memory_space<vmem>>, vector<1x8x32xf32>
    %371 = vector.shape_cast %370 : vector<1x8x32xf32> to vector<8x32xf32>
    %372 = vector.shape_cast %368 : vector<8x32xf32> to vector<1x8x32xf32>
    tpu.vector_store %arg5[%c0_146, %c0_147, %c416], %372 {strides = array<i32>} : memref<2x8x512xf32, #tpu.memory_space<vmem>>, vector<1x8x32xf32>,
    %c1_148 = arith.constant 1 : index
    %c0_149 = arith.constant 0 : index
    %c416_150 = arith.constant 416 : index
    %373 = vector.load %arg5[%c1_148, %c0_149, %c416_150] : memref<2x8x512xf32, #tpu.memory_space<vmem>>, vector<1x8x32xf32>
    %374 = vector.shape_cast %373 : vector<1x8x32xf32> to vector<8x32xf32>
    %375 = vector.shape_cast %366 : vector<8x32xf32> to vector<1x8x32xf32>
    tpu.vector_store %arg5[%c1_148, %c0_149, %c416_150], %375 {strides = array<i32>} : memref<2x8x512xf32, #tpu.memory_space<vmem>>, vector<1x8x32xf32>,
    %c112 = arith.constant 112 : index
    %c0_151 = arith.constant 0 : index
    %376 = vector.load %arg6[%c112, %c0_151] : memref<128x128xf32, #tpu.memory_space<vmem>>, vector<8x128xf32>
    %c0_152 = arith.constant 0 : index
    %c0_153 = arith.constant 0 : index
    %377 = vector.load %arg3[%c0_152, %c0_153] : memref<32x128xbf16, #tpu.memory_space<vmem>>, vector<32x128xbf16>
    %cst_154 = arith.constant dense<0.000000e+00> : vector<8x128xf32>
    %378 = tpu.matmul %369, %377, %cst_154 {dimension_numbers = #tpu.dot_dimension_numbers<[1], [0], [0], [1], [0, 0, 1, 1], [], []>} : vector<8x32xbf16>, vector<32x128xbf16>, vector<8x128xf32> -> vector<8x128xf32>
    %379 = arith.addf %376, %378 : vector<8x128xf32>
    %380 = arith.negf %379 : vector<8x128xf32>
    %381 = math.exp %380 : vector<8x128xf32>
    %cst_155 = arith.constant 1.000000e+00 : f32
    %382 = vector.broadcast %cst_155 : f32 to vector<8x128xf32>
    %383 = arith.addf %382, %381 : vector<8x128xf32>
    %384 = arith.divf %382, %383 : vector<8x128xf32>
    %385 = vector.extract_strided_slice %379 {offsets = [0, 0], sizes = [8, 32], strides = [1, 1]} : vector<8x128xf32> to vector<8x32xf32>
    %386 = math.tanh %385 : vector<8x32xf32>
    %387 = vector.extract_strided_slice %384 {offsets = [0, 32], sizes = [8, 32], strides = [1, 1]} : vector<8x128xf32> to vector<8x32xf32>
    %388 = vector.extract_strided_slice %384 {offsets = [0, 64], sizes = [8, 32], strides = [1, 1]} : vector<8x128xf32> to vector<8x32xf32>
    %389 = vector.extract_strided_slice %384 {offsets = [0, 96], sizes = [8, 32], strides = [1, 1]} : vector<8x128xf32> to vector<8x32xf32>
    %390 = arith.mulf %386, %387 : vector<8x32xf32>
    %391 = arith.mulf %388, %366 : vector<8x32xf32>
    %392 = arith.addf %390, %391 : vector<8x32xf32>
    %393 = math.tanh %392 : vector<8x32xf32>
    %394 = arith.mulf %389, %393 : vector<8x32xf32>
    %395 = arith.truncf %394 : vector<8x32xf32> to vector<8x32xbf16>
    %c0_156 = arith.constant 0 : index
    %c0_157 = arith.constant 0 : index
    %c448 = arith.constant 448 : index
    %396 = vector.load %arg5[%c0_156, %c0_157, %c448] : memref<2x8x512xf32, #tpu.memory_space<vmem>>, vector<1x8x32xf32>
    %397 = vector.shape_cast %396 : vector<1x8x32xf32> to vector<8x32xf32>
    %398 = vector.shape_cast %394 : vector<8x32xf32> to vector<1x8x32xf32>
    tpu.vector_store %arg5[%c0_156, %c0_157, %c448], %398 {strides = array<i32>} : memref<2x8x512xf32, #tpu.memory_space<vmem>>, vector<1x8x32xf32>,
    %c1_158 = arith.constant 1 : index
    %c0_159 = arith.constant 0 : index
    %c448_160 = arith.constant 448 : index
    %399 = vector.load %arg5[%c1_158, %c0_159, %c448_160] : memref<2x8x512xf32, #tpu.memory_space<vmem>>, vector<1x8x32xf32>
    %400 = vector.shape_cast %399 : vector<1x8x32xf32> to vector<8x32xf32>
    %401 = vector.shape_cast %392 : vector<8x32xf32> to vector<1x8x32xf32>
    tpu.vector_store %arg5[%c1_158, %c0_159, %c448_160], %401 {strides = array<i32>} : memref<2x8x512xf32, #tpu.memory_space<vmem>>, vector<1x8x32xf32>,
    %c120 = arith.constant 120 : index
    %c0_161 = arith.constant 0 : index
    %402 = vector.load %arg6[%c120, %c0_161] : memref<128x128xf32, #tpu.memory_space<vmem>>, vector<8x128xf32>
    %c0_162 = arith.constant 0 : index
    %c0_163 = arith.constant 0 : index
    %403 = vector.load %arg3[%c0_162, %c0_163] : memref<32x128xbf16, #tpu.memory_space<vmem>>, vector<32x128xbf16>
    %cst_164 = arith.constant dense<0.000000e+00> : vector<8x128xf32>
    %404 = tpu.matmul %395, %403, %cst_164 {dimension_numbers = #tpu.dot_dimension_numbers<[1], [0], [0], [1], [0, 0, 1, 1], [], []>} : vector<8x32xbf16>, vector<32x128xbf16>, vector<8x128xf32> -> vector<8x128xf32>
    %405 = arith.addf %402, %404 : vector<8x128xf32>
    %406 = arith.negf %405 : vector<8x128xf32>
    %407 = math.exp %406 : vector<8x128xf32>
    %cst_165 = arith.constant 1.000000e+00 : f32
    %408 = vector.broadcast %cst_165 : f32 to vector<8x128xf32>
    %409 = arith.addf %408, %407 : vector<8x128xf32>
    %410 = arith.divf %408, %409 : vector<8x128xf32>
    %411 = vector.extract_strided_slice %405 {offsets = [0, 0], sizes = [8, 32], strides = [1, 1]} : vector<8x128xf32> to vector<8x32xf32>
    %412 = math.tanh %411 : vector<8x32xf32>
    %413 = vector.extract_strided_slice %410 {offsets = [0, 32], sizes = [8, 32], strides = [1, 1]} : vector<8x128xf32> to vector<8x32xf32>
    %414 = vector.extract_strided_slice %410 {offsets = [0, 64], sizes = [8, 32], strides = [1, 1]} : vector<8x128xf32> to vector<8x32xf32>
    %415 = vector.extract_strided_slice %410 {offsets = [0, 96], sizes = [8, 32], strides = [1, 1]} : vector<8x128xf32> to vector<8x32xf32>
    %416 = arith.mulf %412, %413 : vector<8x32xf32>
    %417 = arith.mulf %414, %392 : vector<8x32xf32>
    %418 = arith.addf %416, %417 : vector<8x32xf32>
    %419 = math.tanh %418 : vector<8x32xf32>
    %420 = arith.mulf %415, %419 : vector<8x32xf32>
    %c0_166 = arith.constant 0 : index
    %c0_167 = arith.constant 0 : index
    %c480 = arith.constant 480 : index
    %421 = vector.load %arg5[%c0_166, %c0_167, %c480] : memref<2x8x512xf32, #tpu.memory_space<vmem>>, vector<1x8x32xf32>
    %422 = vector.shape_cast %421 : vector<1x8x32xf32> to vector<8x32xf32>
    %423 = vector.shape_cast %420 : vector<8x32xf32> to vector<1x8x32xf32>
    tpu.vector_store %arg5[%c0_166, %c0_167, %c480], %423 {strides = array<i32>} : memref<2x8x512xf32, #tpu.memory_space<vmem>>, vector<1x8x32xf32>,
    %c1_168 = arith.constant 1 : index
    %c0_169 = arith.constant 0 : index
    %c480_170 = arith.constant 480 : index
    %424 = vector.load %arg5[%c1_168, %c0_169, %c480_170] : memref<2x8x512xf32, #tpu.memory_space<vmem>>, vector<1x8x32xf32>
    %425 = vector.shape_cast %424 : vector<1x8x32xf32> to vector<8x32xf32>
    %426 = vector.shape_cast %418 : vector<8x32xf32> to vector<1x8x32xf32>
    tpu.vector_store %arg5[%c1_168, %c0_169, %c480_170], %426 {strides = array<i32>} : memref<2x8x512xf32, #tpu.memory_space<vmem>>, vector<1x8x32xf32>,
    return
  }
  func.func @transform_0(%arg0: i32) -> (i32, i32) {
    %c0_i32 = arith.constant 0 : i32
    %c0_i32_0 = arith.constant 0 : i32
    %c0_i32_1 = arith.constant 0 : i32
    return %c0_i32, %c0_i32_0 : i32, i32
  }
  func.func @transform_1(%arg0: i32) -> (i32, i32) {
    %c0_i32 = arith.constant 0 : i32
    %c0_i32_0 = arith.constant 0 : i32
    %c0_i32_1 = arith.constant 0 : i32
    return %c0_i32, %c0_i32_0 : i32, i32
  }
  func.func @transform_2(%arg0: i32) -> (i32, i32) {
    %c0_i32 = arith.constant 0 : i32
    %c0_i32_0 = arith.constant 0 : i32
    %c0_i32_1 = arith.constant 0 : i32
    return %c0_i32, %c0_i32_0 : i32, i32
  }
  func.func @transform_3(%arg0: i32) -> (i32, i32) {
    %c0_i32 = arith.constant 0 : i32
    %c0_i32_0 = arith.constant 0 : i32
    %c0_i32_1 = arith.constant 0 : i32
    return %c0_i32, %c0_i32_0 : i32, i32
  }
  func.func @transform_4(%arg0: i32) -> (i32, i32, i32) {
    %c0_i32 = arith.constant 0 : i32
    %c0_i32_0 = arith.constant 0 : i32
    %c0_i32_1 = arith.constant 0 : i32
    %c0_i32_2 = arith.constant 0 : i32
    return %c0_i32, %c0_i32_0, %c0_i32_1 : i32, i32, i32
  }
}

</mosaic_0001>

<bundles_post_ra>
// kernel: squeeze.2
= control target key start
LH: loop header
LB: loop body
LE: loop exit
PB: predicated region body
PF: predicated region fallthrough
CT: control target
= control target key end

     0   :  { %vm44_vm0 = vcmask 1047556   ;;  %s221_s14 = smov 96   ;;  %s222_s27 = smov 64   ;;  %vm3_vm1 = vcmask 261120   ;;  %s442_s0 = inlined_call_operand.vmem [shape: f32[1,8,512], index: 0, kind: input, shape index: {}]   ;;  %s443_s1 = inlined_call_operand.vmem [shape: f32[8,16,32], index: 1, kind: output, shape index: {}]  }
   0x1   :  { %v190_v0 = vld [vmem:[%s442_s0 + $0x4] ss:$8 sm:$0xf]   ;;  %v191_v1 = vld [vmem:[%s442_s0 - $0x1b] ss:$8 sm:$0xf0]  }
   0x2   :  { %v67_v2 = vsel %vm44_vm0, %v191_v1, %v190_v0  ;;  %v41_v3 = vld [vmem:[%s442_s0] ss:$8 sm:$0xf]   ;;  %v185_v4 = vld [vmem:[%s442_s0 - $0x1f] ss:$8 sm:$0xf0]  }
   0x3   :  { %68 = vrot.lane.b32.xlu1 %v67_v2, %s221_s14  ;;  %v45_v5 = vsel %vm44_vm0, %v185_v4, %v41_v3  ;;  %v193_v6 = vld [vmem:[%s442_s0 + $0x6] ss:$8 sm:$0xf]   ;;  %v194_v7 = vld [vmem:[%s442_s0 - $0x19] ss:$8 sm:$0xf0]  }
   0x4   :  { %46 = vrot.lane.b32.xlu0 %v45_v5, %s221_s14  ;;  %v187_v8 = vld [vmem:[%s442_s0 + $0x2] ss:$8 sm:$0xf]   ;;  %v188_v9 = vld [vmem:[%s442_s0 - $0x1d] ss:$8 sm:$0xf0]   ;;  %v78_v12 = vsel %vm44_vm0, %v194_v7, %v193_v6 }
   0x5   :  { %v84_v10 = vld [vmem:[%s442_s0] ss:$8 sm:$0xf]   ;;  %v196_v11 = vld [vmem:[%s442_s0 - $0x1f] ss:$8 sm:$0xf0]   ;;  %v56_v14 = vsel %vm44_vm0, %v188_v9, %v187_v8 }
   0x6   :  { %v88_v13 = vsel %vm44_vm0, %v196_v11, %v84_v10  ;;  %v198_v15 = vld [vmem:[%s442_s0 + $0x2] ss:$8 sm:$0xf]   ;;  %v199_v16 = vld [vmem:[%s442_s0 - $0x1d] ss:$8 sm:$0xf0]  }
   0x7   :  { %89 = vrot.lane.b32.xlu2 %v88_v13, %s222_s27  ;;  %v204_v17 = vld [vmem:[%s442_s0 + $0x6] ss:$8 sm:$0xf]   ;;  %v205_v18 = vld [vmem:[%s442_s0 - $0x19] ss:$8 sm:$0xf0]   ;;  %v99_v21 = vsel %vm44_vm0, %v199_v16, %v198_v15 }
   0x8   :  { %v201_v19 = vld [vmem:[%s442_s0 + $0x4] ss:$8 sm:$0xf]   ;;  %v202_v20 = vld [vmem:[%s442_s0 - $0x1b] ss:$8 sm:$0xf0]   ;;  %v121_v22 = vsel %vm44_vm0, %v205_v18, %v204_v17 }
   0x9   :  { %v110_v23 = vsel %vm44_vm0, %v202_v20, %v201_v19  ;;  %v127_v24 = vld [vmem:[%s442_s0] ss:$8 sm:$0xf]   ;;  %v207_v25 = vld [vmem:[%s442_s0 - $0x1f] ss:$8 sm:$0xf0]  }
   0xa   :  { %v212_v26 = vld [vmem:[%s442_s0 + $0x4] ss:$8 sm:$0xf]   ;;  %v213_v27 = vld [vmem:[%s442_s0 - $0x1b] ss:$8 sm:$0xf0]   ;;  %v131_v30 = vsel %vm44_vm0, %v207_v25, %v127_v24 }
   0xb   :  { %79 = vrot.lane.b32.xlu1 %v78_v12, %s221_s14  ;;  %v209_v28 = vld [vmem:[%s442_s0 + $0x2] ss:$8 sm:$0xf]   ;;  %v210_v29 = vld [vmem:[%s442_s0 - $0x1d] ss:$8 sm:$0xf0]   ;;  %v153_v31 = vsel %vm44_vm0, %v213_v27, %v212_v26 }
   0xc   :  { %57 = vrot.lane.b32.xlu0 %v56_v14, %s221_s14  ;;  %v142_v32 = vsel %vm44_vm0, %v210_v29, %v209_v28  ;;  %s223_s23 = smov 32   ;;  %v215_v33 = vld [vmem:[%s442_s0 + $0x6] ss:$8 sm:$0xf]  }
   0xd   :  { %v216_v34 = vld [vmem:[%s442_s0 - $0x19] ss:$8 sm:$0xf0]  }
   0xe   :  { %v164_v35 = vsel %vm44_vm0, %v216_v34, %v215_v33  ;;  %v2_v38 = vld [vmem:[%s442_s0] sm:$0xff]   ;;  %v170_v39 = vld [vmem:[%s442_s0 + $0x8] sm:$0xff]   ;;  %v175_v43 = vld [vmem:[%s442_s0 + $0x10] sm:$0xff]  }
   0xf   :  { %100 = vrot.lane.b32.xlu2 %v99_v21, %s222_s27  ;;  %4 = vst.msk [vmem:[%s443_s1] ss:$16 sm:$0x3] %vm3_vm1, %v2_v38   ;;  %v180_v47 = vld [vmem:[%s442_s0 + $0x18] sm:$0xff]  }
  0x10   :  { %5 = vst.msk [vmem:[%s443_s1] ss:$16 sm:$0xc] %vm3_vm1, %v2_v38  }
  0x11   :  { %6 = vst.msk [vmem:[%s443_s1] ss:$16 sm:$0x30] %vm3_vm1, %v2_v38  }
  0x12   :  { %7 = vst.msk [vmem:[%s443_s1] ss:$16 sm:$0xc0] %vm3_vm1, %v2_v38  }
  0x13   :  { %122 = vrot.lane.b32.xlu1 %v121_v22, %s222_s27  ;;  %171 = vst.msk [vmem:[%s443_s1 + $0x4] ss:$16 sm:$0x3] %vm3_vm1, %v170_v39  }
  0x14   :  { %111 = vrot.lane.b32.xlu0 %v110_v23, %s222_s27  ;;  %172 = vst.msk [vmem:[%s443_s1 + $0x4] ss:$16 sm:$0xc] %vm3_vm1, %v170_v39  }
  0x15   :  { %173 = vst.msk [vmem:[%s443_s1 + $0x4] ss:$16 sm:$0x30] %vm3_vm1, %v170_v39  }
  0x16   :  { %174 = vst.msk [vmem:[%s443_s1 + $0x4] ss:$16 sm:$0xc0] %vm3_vm1, %v170_v39  }
  0x17   :  { %132 = vrot.lane.b32.xlu2 %v131_v30, %s223_s23  ;;  %176 = vst.msk [vmem:[%s443_s1 + $0x8] ss:$16 sm:$0x3] %vm3_vm1, %v175_v43  }
  0x18   :  { %177 = vst.msk [vmem:[%s443_s1 + $0x8] ss:$16 sm:$0xc] %vm3_vm1, %v175_v43  }
  0x19   :  { %178 = vst.msk [vmem:[%s443_s1 + $0x8] ss:$16 sm:$0x30] %vm3_vm1, %v175_v43  }
  0x1a   :  { %179 = vst.msk [vmem:[%s443_s1 + $0x8] ss:$16 sm:$0xc0] %vm3_vm1, %v175_v43  }
  0x1b   :  { %154 = vrot.lane.b32.xlu1 %v153_v31, %s223_s23  ;;  %181 = vst.msk [vmem:[%s443_s1 + $0xc] ss:$16 sm:$0x3] %vm3_vm1, %v180_v47  }
  0x1c   :  { %143 = vrot.lane.b32.xlu0 %v142_v32, %s223_s23  ;;  %182 = vst.msk [vmem:[%s443_s1 + $0xc] ss:$16 sm:$0xc] %vm3_vm1, %v180_v47  }
  0x1d   :  { %183 = vst.msk [vmem:[%s443_s1 + $0xc] ss:$16 sm:$0x30] %vm3_vm1, %v180_v47  }
  0x1e   :  { %184 = vst.msk [vmem:[%s443_s1 + $0xc] ss:$16 sm:$0xc0] %vm3_vm1, %v180_v47  }
  0x1f   :  { %165 = vrot.lane.b32.xlu2 %v164_v35, %s223_s23 }
  0x61   :  { %v90_v36 = vpop.permute.xlu2 %89  }
  0x62   :  { %197 = vst.msk [vmem:[%s443_s1 + $0x2] ss:$4 sm:$0xff] %vm3_vm1, %v90_v36  }
  0x69   :  { %v101_v37 = vpop.permute.xlu2 %100  }
  0x6a   :  { %200 = vst.msk [vmem:[%s443_s1 + $0x22] ss:$4 sm:$0xff] %vm3_vm1, %v101_v37  }
  0x71   :  { %v133_v40 = vpop.permute.xlu2 %132  }
  0x72   :  { %208 = vst.msk [vmem:[%s443_s1 + $0x3] ss:$4 sm:$0xff] %vm3_vm1, %v133_v40  }
  0x75   :  { %v69_v41 = vpop.permute.xlu1 %68  }
  0x76   :  { %192 = vst.msk [vmem:[%s443_s1 + $0x41] ss:$4 sm:$0xff] %vm3_vm1, %v69_v41   ;;  %v47_v42 = vpop.permute.xlu0 %46  }
  0x77   :  { %186 = vst.msk [vmem:[%s443_s1 + $0x1] ss:$4 sm:$0xff] %vm3_vm1, %v47_v42  }
  0x79   :  { %v166_v44 = vpop.permute.xlu2 %165  }
  0x7a   :  { %217 = vst.msk [vmem:[%s443_s1 + $0x63] ss:$4 sm:$0xff] %vm3_vm1, %v166_v44  }
  0x7d   :  { %v80_v45 = vpop.permute.xlu1 %79  }
  0x7e   :  { %195 = vst.msk [vmem:[%s443_s1 + $0x61] ss:$4 sm:$0xff] %vm3_vm1, %v80_v45   ;;  %v58_v46 = vpop.permute.xlu0 %57  }
  0x7f   :  { %189 = vst.msk [vmem:[%s443_s1 + $0x21] ss:$4 sm:$0xff] %vm3_vm1, %v58_v46  }
  0x85   :  { %v123_v48 = vpop.permute.xlu1 %122  }
  0x86   :  { %206 = vst.msk [vmem:[%s443_s1 + $0x62] ss:$4 sm:$0xff] %vm3_vm1, %v123_v48   ;;  %v112_v49 = vpop.permute.xlu0 %111  }
  0x87   :  { %203 = vst.msk [vmem:[%s443_s1 + $0x42] ss:$4 sm:$0xff] %vm3_vm1, %v112_v49  }
  0x8d   :  { %v155_v50 = vpop.permute.xlu1 %154  }
  0x8e   :  { %214 = vst.msk [vmem:[%s443_s1 + $0x43] ss:$4 sm:$0xff] %vm3_vm1, %v155_v50   ;;  %v144_v51 = vpop.permute.xlu0 %143  }
  0x8f   :  { %211 = vst.msk [vmem:[%s443_s1 + $0x23] ss:$4 sm:$0xff] %vm3_vm1, %v144_v51  }

// kernel: tracker_unroll.1
= control target key start
LH: loop header
LB: loop body
LE: loop exit
PB: predicated region body
PF: predicated region fallthrough
CT: control target
= control target key end

     0   :  { %vm191_vm0 = vcmask 785408   ;;  %s2039_s5 = smov 64   ;;  %vm324_vm5 = vcmask 261120   ;;  %s2040_s14 = smov 32   ;;  %s2613_s1 = inlined_call_operand.vmem [shape: bf16[96,128], index: 1, kind: input, shape index: {}]   ;;  %s2614_s3 = inlined_call_operand.vmem [shape: f32[1,128], index: 3, kind: input, shape index: {}]   ;;  %s2615_s0 = inlined_call_operand.vmem [shape: bf16[128,96], index: 0, kind: input, shape index: {}]   ;;  %s2616_s4 = inlined_call_operand.vmem [shape: f32[2,8,512], index: 4, kind: output, shape index: {}]   ;;  %s2617_s2 = inlined_call_operand.vmem [shape: bf16[32,128], index: 2, kind: input, shape index: {}]  }
   0x1   :  { %v1862_v0 = vld [vmem:[%s2613_s1 + $0x28] sm:$0xff]  ;;  %v1861_v1 = vld [vmem:[%s2613_s1 + $0x20] sm:$0xff]  ;;  %v1860_v2 = vld [vmem:[%s2613_s1 + $0x18] sm:$0xff] }
   0x2   :  { %218 = vmatpush.bf16.msra.mxu0 %v1862_v0  ;;  %1893 = vmatpush.bf16.msra.mxu1 %v1862_v0  ;;  %v1859_v3 = vld [vmem:[%s2613_s1 + $0x10] sm:$0xff]  ;;  %v1858_v4 = vld [vmem:[%s2613_s1 + $0x8] sm:$0xff]  ;;  %v1857_v5 = vld [vmem:[%s2613_s1] sm:$0xff]  ;;  %s2038_s1 = smov 96  }
   0x3   :  { %1894 = vmatpush.bf16.msra.mxu2 %v1862_v0  ;;  %v1849_v6 = vld [vmem:[%s2615_s0] sm:$0xff]  ;;  %v1855_v31 = vld [vmem:[%s2615_s0 + $0x30] sm:$0xff]  ;;  %v1864_v32 = vld [vmem:[%s2617_s2 + $0x8] sm:$0xff] }
   0x4   :  { %v2091_v7 = vld [vmem:[%s2614_s3] ss:$0 sm:$0xff] }
   0x5   :  { %v99_v8 = vmul.f32 0.0, %v2091_v7  ;;  %v1863_v33 = vld [vmem:[%s2617_s2] sm:$0xff] }
   0x6   :  { %219 = vmatpush.bf16.msra.mxu0 %v1861_v1  ;;  %1895 = vmatpush.bf16.msra.mxu1 %v1861_v1 }
   0x7   :  { %1896 = vmatpush.bf16.msra.mxu2 %v1861_v1 }
   0xa   :  { %220 = vmatpush.bf16.msra.mxu0 %v1860_v2  ;;  %1897 = vmatpush.bf16.msra.mxu1 %v1860_v2 }
   0xb   :  { %1898 = vmatpush.bf16.msra.mxu2 %v1860_v2  ;;  %v1856_v2 = vld [vmem:[%s2615_s0 + $0x38] sm:$0xff] }
   0xe   :  { %221 = vmatpush.bf16.msra.mxu0 %v1859_v3  ;;  %1899 = vmatpush.bf16.msra.mxu1 %v1859_v3 }
   0xf   :  { %1900 = vmatpush.bf16.msra.mxu2 %v1859_v3  ;;  %v1866_v3 = vld [vmem:[%s2617_s2 + $0x8] sm:$0xff] }
  0x12   :  { %222 = vmatpush.bf16.msra.mxu0 %v1858_v4  ;;  %1901 = vmatpush.bf16.msra.mxu1 %v1858_v4 }
  0x13   :  { %1902 = vmatpush.bf16.msra.mxu2 %v1858_v4  ;;  %v1850_v4 = vld [vmem:[%s2615_s0 + $0x8] sm:$0xff] }
  0x16   :  { %223 = vmatpush.bf16.msra.mxu0 %v1857_v5  ;;  %1903 = vmatpush.bf16.msra.mxu1 %v1857_v5 }
  0x17   :  { %1904 = vmatpush.bf16.msra.mxu2 %v1857_v5  ;;  %v1865_v5 = vld [vmem:[%s2617_s2] sm:$0xff] }
  0x19   :  { %1674 = vmatmul.msk.bf16.vlgmr.msra.gmra.mxu0 %vm191_vm0, %v1849_v6  ;;  %1680 = vmatmul.msk.bf16.vlgmr.msra.gmra.mxu1 %vm191_vm0, %v1855_v31 }
  0x1a   :  { %357 = vmatpush.bf16.msrb.mxu1 %v1864_v32  ;;  %1681 = vmatmul.msk.bf16.vlgmr.msra.gmra.mxu2 %vm191_vm0, %v1856_v2 }
  0x1b   :  { %447 = vmatpush.bf16.msrb.mxu2 %v1866_v3 }
  0x1e   :  { %358 = vmatpush.bf16.msrb.mxu1 %v1863_v33 }
  0x1f   :  { %448 = vmatpush.bf16.msrb.mxu2 %v1865_v5 }
  0x29   :  { %1675 = vmatmul.msk.bf16.gmra.mxu0 %vm191_vm0, %v1850_v4 }
  0x96   :  { %v225_v9 = vpop.f32.mrf.mxu0  ;;  %v2118_v38 = vpop.f32.mrf.mxu1 }
  0x97   :  { %v226_v10 = vadd.f32 %v225_v9, %v99_v8 }
  0x99   :  { %v1682_v11 = vmul.f32 -1.442695, %v226_v10 }
  0x9b   :  { %1909 = vpow2.f32 %v1682_v11 }
  0x9d   :  { %v2151_v11 = vpop.f32.mrf.mxu2 }
  0x9e   :  { %v2120_v39 = vpop.f32.mrf.mxu1  ;;  %v227_v40 = vpop.f32.mrf.mxu0 }
  0x9f   :  { %v228_v41 = vadd.f32 %v2091_v7, %v227_v40 }
  0xa1   :  { %v1910_v12 = vpop.eup %1909 }
  0xa2   :  { %v285_v13 = vadd.f32 1.0, %v1910_v12 }
  0xa4   :  { %1911 = vrcp.f32 %v285_v13  ;;  %v297_v17 = vand.u32 2147483648, %v285_v13  ;;  %v295_v19 = vand.u32 2147483647, %v285_v13  ;;  %vm291_vm2 = vweird.f32 %v285_v13 }
  0xa5   :  { %1913 = vtanh.f32 %v226_v10  ;;  %v2153_v12 = vpop.f32.mrf.mxu2 }
  0xa6   :  { %v298_v21 = vor.u32 1.1754944e-38, %v297_v17  ;;  %vm296_vm4 = vcmp.eq.f32.partialorder %v295_v19, 8.507059e+37 }
  0xaa   :  { %v1912_v14 = vpop.eup %1911 }
  0xab   :  { %v287_v15 = vmul.f32 %v1912_v14, %v285_v13  ;;  %vm292_vm1 = vweird.f32 %v1912_v14  ;;  %v1914_v26 = vpop.eup %1913  ;;  %v230_v13 = vpop.f32.mrf.mxu0 }
  0xac   :  { %vm293_vm3 = vmor %vm291_vm2, %vm292_vm1 }
  0xad   :  { %v288_v16 = vsub.f32 1.0, %v287_v15 }
  0xaf   :  { %v289_v18 = vmul.f32 %v1912_v14, %v288_v16 }
  0xb1   :  { %v290_v20 = vadd.f32 %v1912_v14, %v289_v18 }
  0xb3   :  { %v294_v22 = vsel %vm293_vm3, %v1912_v14, %v290_v20  ;;  %v231_v14 = vadd.f32 %v2091_v7, %v230_v13 }
  0xb4   :  { %v299_v23 = vsel %vm296_vm4, %v298_v21, %v294_v22 }
  0xb5   :  { %303 = vrot.lane.b32.xlu0 %v299_v23, %s2038_s1  ;;  %v307_v24 = vmul.f32 0.0, %v299_v23 }
  0xbd   :  { %309 = vrot.lane.b32.xlu0 %v307_v24, %s2039_s5 }
 0x127   :  { %v304_v25 = vpop.permute.xlu0 %303 }
 0x128   :  { %v306_v27 = vmul.f32 %v1914_v26, %v304_v25 }
 0x12f   :  { %v310_v28 = vpop.permute.xlu0 %309 }
 0x130   :  { %v312_v29 = vadd.f32 %v310_v28, %v306_v27 }
 0x132   :  { %1915 = vtanh.f32 %v312_v29  ;;  %1683 = vst.msk [vmem:[%s2616_s4 + $0x20] sm:$0xff] %vm324_vm5, %v312_v29  ;;  %391 = vrot.lane.b32.xlu2 %v312_v29, %s2039_s5 }
 0x138   :  { %v1916_v30 = vpop.eup %1915 }
 0x139   :  { %315 = vrot.lane.b32.xlu1 %v1916_v30, %s2038_s1 }
 0x18c   :  { %v392_v57 = vpop.permute.xlu2 %391 }
 0x1ab   :  { %v316_v34 = vpop.permute.xlu1 %315 }
 0x1ac   :  { %v2112_v35 = vmul.f32 %v316_v34, %v299_v23 }
 0x1ae   :  { %v319_v36 = vpack.c.bf16 %v2112_v35, %v2112_v35 }
 0x1b0   :  { %334 = vrot.lane.b32.xlu1 %v319_v36, %s2040_s14 }
 0x222   :  { %v335_v37 = vpop.permute.xlu1 %334 }
 0x223   :  { %1692 = vmatmul.msk.bf16.vlgmr.msrb.gmra.mxu1 %vm324_vm5, %v335_v37 }
 0x2a0   :  { %v360_v42 = vpop.f32.mrf.mxu1 }
 0x2a1   :  { %v364_v43 = vadd.f32 %v360_v42, %v228_v41  ;;  %v1868_v42 = vld [vmem:[%s2617_s2 + $0x8] sm:$0xff] }
 0x2a2   :  { %536 = vmatpush.bf16.msra.mxu3 %v1868_v42 }
 0x2a3   :  { %v1693_v44 = vmul.f32 -1.442695, %v364_v43 }
 0x2a5   :  { %1917 = vpow2.f32 %v1693_v44 }
 0x2a8   :  { %v362_v45 = vpop.f32.mrf.mxu1 }
 0x2ab   :  { %v1918_v46 = vpop.eup %1917 }
 0x2ac   :  { %v368_v47 = vadd.f32 1.0, %v1918_v46 }
 0x2ae   :  { %1919 = vrcp.f32 %v368_v47  ;;  %v380_v51 = vand.u32 2147483648, %v368_v47  ;;  %v378_v53 = vand.u32 2147483647, %v368_v47  ;;  %vm374_vm7 = vweird.f32 %v368_v47 }
 0x2af   :  { %1921 = vtanh.f32 %v364_v43  ;;  %v1867_v43 = vld [vmem:[%s2617_s2] sm:$0xff] }
 0x2b0   :  { %v381_v55 = vor.u32 1.1754944e-38, %v380_v51  ;;  %vm379_vm9 = vcmp.eq.f32.partialorder %v378_v53, 8.507059e+37  ;;  %537 = vmatpush.bf16.msra.mxu3 %v1867_v43 }
 0x2b4   :  { %v1920_v48 = vpop.eup %1919 }
 0x2b5   :  { %v370_v49 = vmul.f32 %v1920_v48, %v368_v47  ;;  %vm375_vm6 = vweird.f32 %v1920_v48  ;;  %v1922_v61 = vpop.eup %1921 }
 0x2b6   :  { %vm376_vm8 = vmor %vm374_vm7, %vm375_vm6 }
 0x2b7   :  { %v371_v50 = vsub.f32 1.0, %v370_v49 }
 0x2b9   :  { %v372_v52 = vmul.f32 %v1920_v48, %v371_v50 }
 0x2bb   :  { %v373_v54 = vadd.f32 %v1920_v48, %v372_v52 }
 0x2bd   :  { %v377_v56 = vsel %vm376_vm8, %v1920_v48, %v373_v54  ;;  %v232_v48 = vpop.f32.mrf.mxu0 }
 0x2be   :  { %v382_v58 = vsel %vm379_vm9, %v381_v55, %v377_v56  ;;  %v233_v49 = vadd.f32 %v2091_v7, %v232_v48 }
 0x2bf   :  { %386 = vrot.lane.b32.xlu2 %v382_v58, %s2038_s1  ;;  %v394_v59 = vmul.f32 %v392_v57, %v382_v58 }
 0x2c1   :  { %396 = vrot.lane.b32.xlu0 %v394_v59, %s2039_s5 }
 0x319   :  { %v387_v60 = vpop.permute.xlu2 %386 }
 0x31a   :  { %v389_v62 = vmul.f32 %v1922_v61, %v387_v60 }
 0x333   :  { %v397_v63 = vpop.permute.xlu0 %396 }
 0x334   :  { %v2125_v0 = vadd.f32 %v397_v63, %v389_v62 }
 0x336   :  { %1923 = vtanh.f32 %v2125_v0  ;;  %480 = vrot.lane.b32.xlu0 %v2125_v0, %s2039_s5 }
 0x33c   :  { %v1924_v1 = vpop.eup %1923 }
 0x33d   :  { %402 = vrot.lane.b32.xlu1 %v1924_v1, %s2038_s1 }
 0x3a8   :  { %v481_v30 = vpop.permute.xlu0 %480 }
 0x3af   :  { %v403_v6 = vpop.permute.xlu1 %402 }
 0x3b0   :  { %v2145_v8 = vmul.f32 %v403_v6, %v382_v58 }
 0x3b2   :  { %v406_v9 = vpack.c.bf16 %v2145_v8, %v2145_v8 }
 0x3b4   :  { %424 = vrot.lane.b32.xlu2 %v406_v9, %s2040_s14 }
 0x40e   :  { %v425_v10 = vpop.permute.xlu2 %424 }
 0x40f   :  { %1703 = vmatmul.msk.bf16.vlgmr.msrb.gmra.mxu2 %vm324_vm5, %v425_v10 }
 0x492   :  { %v450_v15 = vpop.f32.mrf.mxu2 }
 0x493   :  { %v454_v16 = vadd.f32 %v450_v15, %v231_v14  ;;  %v1870_v15 = vld [vmem:[%s2617_s2 + $0x8] sm:$0xff] }
 0x494   :  { %618 = vmatpush.bf16.msra.mxu1 %v1870_v15 }
 0x495   :  { %v1704_v17 = vmul.f32 -1.442695, %v454_v16 }
 0x497   :  { %1925 = vpow2.f32 %v1704_v17  ;;  %v1869_v17 = vld [vmem:[%s2617_s2] sm:$0xff] }
 0x498   :  { %619 = vmatpush.bf16.msra.mxu1 %v1869_v17 }
 0x49a   :  { %v452_v18 = vpop.f32.mrf.mxu2 }
 0x49d   :  { %v1926_v19 = vpop.eup %1925 }
 0x49e   :  { %v458_v20 = vadd.f32 1.0, %v1926_v19 }
 0x4a0   :  { %1927 = vrcp.f32 %v458_v20  ;;  %v470_v24 = vand.u32 2147483648, %v458_v20  ;;  %v468_v26 = vand.u32 2147483647, %v458_v20  ;;  %vm464_vm11 = vweird.f32 %v458_v20 }
 0x4a1   :  { %1929 = vtanh.f32 %v454_v16  ;;  %v1851_v16 = vld [vmem:[%s2615_s0 + $0x10] sm:$0xff] }
 0x4a2   :  { %v471_v28 = vor.u32 1.1754944e-38, %v470_v24  ;;  %vm469_vm13 = vcmp.eq.f32.partialorder %v468_v26, 8.507059e+37  ;;  %1676 = vmatmul.msk.bf16.gmra.mxu0 %vm191_vm0, %v1851_v16 }
 0x4a6   :  { %v1928_v21 = vpop.eup %1927 }
 0x4a7   :  { %v460_v22 = vmul.f32 %v1928_v21, %v458_v20  ;;  %vm465_vm10 = vweird.f32 %v1928_v21  ;;  %v1930_v33 = vpop.eup %1929 }
 0x4a8   :  { %vm466_vm12 = vmor %vm464_vm11, %vm465_vm10 }
 0x4a9   :  { %v461_v23 = vsub.f32 1.0, %v460_v22 }
 0x4ab   :  { %v462_v25 = vmul.f32 %v1928_v21, %v461_v23 }
 0x4ad   :  { %v463_v27 = vadd.f32 %v1928_v21, %v462_v25 }
 0x4af   :  { %v467_v29 = vsel %vm466_vm12, %v1928_v21, %v463_v27 }
 0x4b0   :  { %v472_v31 = vsel %vm469_vm13, %v471_v28, %v467_v29 }
 0x4b1   :  { %476 = vrot.lane.b32.xlu1 %v472_v31, %s2038_s1  ;;  %v483_v32 = vmul.f32 %v481_v30, %v472_v31 }
 0x4b3   :  { %485 = vrot.lane.b32.xlu2 %v483_v32, %s2039_s5 }
 0x50d   :  { %v486_v37 = vpop.permute.xlu2 %485 }
 0x51f   :  { %v235_v22 = vpop.f32.mrf.mxu0 }
 0x520   :  { %v236_v23 = vadd.f32 %v2091_v7, %v235_v22 }
 0x523   :  { %v477_v34 = vpop.permute.xlu1 %476 }
 0x524   :  { %v479_v36 = vmul.f32 %v1930_v33, %v477_v34 }
 0x526   :  { %v488_v40 = vadd.f32 %v486_v37, %v479_v36 }
 0x528   :  { %1931 = vtanh.f32 %v488_v40  ;;  %503 = vrot.lane.b32.xlu2 %v488_v40, %s2039_s5 }
 0x52e   :  { %v1932_v41 = vpop.eup %1931 }
 0x52f   :  { %491 = vrot.lane.b32.xlu0 %v1932_v41, %s2038_s1 }
 0x582   :  { %v2173_v2 = vpop.permute.xlu2 %503 }
 0x5a1   :  { %v492_v44 = vpop.permute.xlu0 %491 }
 0x5a2   :  { %v2166_v45 = vmul.f32 %v492_v44, %v472_v31 }
 0x5a4   :  { %v495_v46 = vpack.c.bf16 %v2166_v45, %v2166_v45 }
 0x5a6   :  { %513 = vrot.lane.b32.xlu1 %v495_v46, %s2040_s14 }
 0x618   :  { %v514_v47 = vpop.permute.xlu1 %513 }
 0x619   :  { %1714 = vmatmul.msk.bf16.vlgmr.msra.gmra.mxu3 %vm324_vm5, %v514_v47 }
 0x69c   :  { %v539_v50 = vpop.f32.mrf.mxu3 }
 0x69d   :  { %v543_v51 = vadd.f32 %v539_v50, %v233_v49 }
 0x69f   :  { %v1715_v52 = vmul.f32 -1.442695, %v543_v51 }
 0x6a1   :  { %1933 = vpow2.f32 %v1715_v52  ;;  %v1872_v52 = vld [vmem:[%s2617_s2 + $0x8] sm:$0xff] }
 0x6a2   :  { %702 = vmatpush.bf16.msra.mxu2 %v1872_v52 }
 0x6a4   :  { %v541_v53 = vpop.f32.mrf.mxu3 }
 0x6a5   :  { %v1871_v53 = vld [vmem:[%s2617_s2] sm:$0xff] }
 0x6a6   :  { %703 = vmatpush.bf16.msra.mxu2 %v1871_v53 }
 0x6a7   :  { %v1934_v54 = vpop.eup %1933 }
 0x6a8   :  { %v547_v55 = vadd.f32 1.0, %v1934_v54 }
 0x6aa   :  { %1935 = vrcp.f32 %v547_v55  ;;  %v559_v59 = vand.u32 2147483648, %v547_v55  ;;  %v557_v61 = vand.u32 2147483647, %v547_v55  ;;  %vm553_vm15 = vweird.f32 %v547_v55 }
 0x6ab   :  { %1937 = vtanh.f32 %v543_v51 }
 0x6ac   :  { %v560_v63 = vor.u32 1.1754944e-38, %v559_v59  ;;  %vm558_vm2 = vcmp.eq.f32.partialorder %v557_v61, 8.507059e+37 }
 0x6b0   :  { %v1936_v56 = vpop.eup %1935 }
 0x6b1   :  { %v549_v57 = vmul.f32 %v1936_v56, %v547_v55  ;;  %vm554_vm14 = vweird.f32 %v1936_v56  ;;  %v1938_v5 = vpop.eup %1937 }
 0x6b2   :  { %vm555_vm1 = vmor %vm553_vm15, %vm554_vm14 }
 0x6b3   :  { %v550_v58 = vsub.f32 1.0, %v549_v57 }
 0x6b5   :  { %v551_v60 = vmul.f32 %v1936_v56, %v550_v58  ;;  %v237_v58 = vpop.f32.mrf.mxu0 }
 0x6b6   :  { %v238_v59 = vadd.f32 %v2091_v7, %v237_v58 }
 0x6b7   :  { %v552_v62 = vadd.f32 %v1936_v56, %v551_v60 }
 0x6b9   :  { %v556_v1 = vsel %vm555_vm1, %v1936_v56, %v552_v62 }
 0x6ba   :  { %v561_v3 = vsel %vm558_vm2, %v560_v63, %v556_v1 }
 0x6bb   :  { %565 = vrot.lane.b32.xlu0 %v561_v3, %s2038_s1  ;;  %v569_v4 = vmul.f32 %v561_v3, %v2173_v2 }
 0x6bd   :  { %571 = vrot.lane.b32.xlu1 %v569_v4, %s2039_s5 }
 0x72d   :  { %v566_v6 = vpop.permute.xlu0 %565 }
 0x72e   :  { %v568_v9 = vmul.f32 %v1938_v5, %v566_v6 }
 0x72f   :  { %v572_v10 = vpop.permute.xlu1 %571 }
 0x730   :  { %v2178_v13 = vadd.f32 %v572_v10, %v568_v9 }
 0x732   :  { %1939 = vtanh.f32 %v2178_v13  ;;  %651 = vrot.lane.b32.xlu1 %v2178_v13, %s2039_s5 }
 0x738   :  { %v1940_v14 = vpop.eup %1939 }
 0x739   :  { %577 = vrot.lane.b32.xlu2 %v1940_v14, %s2038_s1 }
 0x793   :  { %v578_v18 = vpop.permute.xlu2 %577 }
 0x794   :  { %v2194_v19 = vmul.f32 %v578_v18, %v561_v3 }
 0x796   :  { %v581_v20 = vpack.c.bf16 %v2194_v19, %v2194_v19 }
 0x798   :  { %595 = vrot.lane.b32.xlu0 %v581_v20, %s2040_s14 }
 0x7a4   :  { %v652_v42 = vpop.permute.xlu1 %651 }
 0x80a   :  { %v596_v21 = vpop.permute.xlu0 %595 }
 0x80b   :  { %1725 = vmatmul.msk.bf16.vlgmr.msra.gmra.mxu1 %vm324_vm5, %v596_v21 }
 0x888   :  { %v621_v24 = vpop.f32.mrf.mxu1 }
 0x889   :  { %v625_v25 = vadd.f32 %v621_v24, %v236_v23 }
 0x88b   :  { %v1726_v26 = vmul.f32 -1.442695, %v625_v25 }
 0x88d   :  { %1941 = vpow2.f32 %v1726_v26 }
 0x890   :  { %v623_v27 = vpop.f32.mrf.mxu1 }
 0x893   :  { %v1942_v28 = vpop.eup %1941 }
 0x894   :  { %v629_v29 = vadd.f32 1.0, %v1942_v28  ;;  %v1874_v28 = vld [vmem:[%s2617_s2 + $0x8] sm:$0xff] }
 0x895   :  { %791 = vmatpush.bf16.msrb.mxu3 %v1874_v28 }
 0x896   :  { %1943 = vrcp.f32 %v629_v29  ;;  %v641_v33 = vand.u32 2147483648, %v629_v29  ;;  %v639_v36 = vand.u32 2147483647, %v629_v29  ;;  %vm635_vm4 = vweird.f32 %v629_v29 }
 0x897   :  { %1945 = vtanh.f32 %v625_v25 }
 0x898   :  { %v642_v40 = vor.u32 1.1754944e-38, %v641_v33  ;;  %vm640_vm7 = vcmp.eq.f32.partialorder %v639_v36, 8.507059e+37 }
 0x89c   :  { %v1944_v30 = vpop.eup %1943 }
 0x89d   :  { %v631_v31 = vmul.f32 %v1944_v30, %v629_v29  ;;  %vm636_vm3 = vweird.f32 %v1944_v30  ;;  %v1946_v47 = vpop.eup %1945  ;;  %v1852_v29 = vld [vmem:[%s2615_s0 + $0x18] sm:$0xff] }
 0x89e   :  { %vm637_vm6 = vmor %vm635_vm4, %vm636_vm3  ;;  %1677 = vmatmul.msk.bf16.gmra.mxu0 %vm191_vm0, %v1852_v29 }
 0x89f   :  { %v632_v32 = vsub.f32 1.0, %v631_v31 }
 0x8a1   :  { %v633_v34 = vmul.f32 %v1944_v30, %v632_v32 }
 0x8a3   :  { %v634_v37 = vadd.f32 %v1944_v30, %v633_v34 }
 0x8a5   :  { %v638_v41 = vsel %vm637_vm6, %v1944_v30, %v634_v37  ;;  %v1873_v30 = vld [vmem:[%s2617_s2] sm:$0xff] }
 0x8a6   :  { %v643_v43 = vsel %vm640_vm7, %v642_v40, %v638_v41  ;;  %792 = vmatpush.bf16.msrb.mxu3 %v1873_v30 }
 0x8a7   :  { %647 = vrot.lane.b32.xlu2 %v643_v43, %s2038_s1  ;;  %v654_v44 = vmul.f32 %v652_v42, %v643_v43 }
 0x8a9   :  { %656 = vrot.lane.b32.xlu0 %v654_v44, %s2039_s5 }
 0x901   :  { %v648_v46 = vpop.permute.xlu2 %647 }
 0x902   :  { %v650_v48 = vmul.f32 %v1946_v47, %v648_v46 }
 0x91b   :  { %v657_v49 = vpop.permute.xlu0 %656  ;;  %v240_v36 = vpop.f32.mrf.mxu0 }
 0x91c   :  { %v659_v50 = vadd.f32 %v657_v49, %v650_v48  ;;  %v241_v37 = vadd.f32 %v2091_v7, %v240_v36 }
 0x91e   :  { %1947 = vtanh.f32 %v659_v50  ;;  %1727 = vst.msk [vmem:[%s2616_s4 + $0x28] sm:$0xff] %vm324_vm5, %v659_v50  ;;  %736 = vrot.lane.b32.xlu0 %v659_v50, %s2039_s5 }
 0x924   :  { %v1948_v51 = vpop.eup %1947 }
 0x925   :  { %662 = vrot.lane.b32.xlu1 %v1948_v51, %s2038_s1 }
 0x990   :  { %v737_v18 = vpop.permute.xlu0 %736 }
 0x997   :  { %v663_v54 = vpop.permute.xlu1 %662 }
 0x998   :  { %v2215_v55 = vmul.f32 %v663_v54, %v643_v43 }
 0x99a   :  { %v666_v56 = vpack.c.bf16 %v2215_v55, %v2215_v55 }
 0x99c   :  { %679 = vrot.lane.b32.xlu2 %v666_v56, %s2040_s14 }
 0x9f6   :  { %v680_v57 = vpop.permute.xlu2 %679 }
 0x9f7   :  { %1736 = vmatmul.msk.bf16.vlgmr.msra.gmra.mxu2 %vm324_vm5, %v680_v57 }
 0xa7a   :  { %v705_v60 = vpop.f32.mrf.mxu2 }
 0xa7b   :  { %v709_v61 = vadd.f32 %v705_v60, %v238_v59 }
 0xa7d   :  { %v1737_v62 = vmul.f32 -1.442695, %v709_v61 }
 0xa7f   :  { %1949 = vpow2.f32 %v1737_v62 }
 0xa82   :  { %v707_v63 = vpop.f32.mrf.mxu2 }
 0xa85   :  { %v1950_v1 = vpop.eup %1949 }
 0xa86   :  { %v713_v3 = vadd.f32 1.0, %v1950_v1 }
 0xa88   :  { %1951 = vrcp.f32 %v713_v3  ;;  %v725_v9 = vand.u32 2147483648, %v713_v3  ;;  %v723_v14 = vand.u32 2147483647, %v713_v3  ;;  %vm719_vm9 = vweird.f32 %v713_v3 }
 0xa89   :  { %1953 = vtanh.f32 %v709_v61 }
 0xa8a   :  { %v726_v16 = vor.u32 1.1754944e-38, %v725_v9  ;;  %vm724_vm11 = vcmp.eq.f32.partialorder %v723_v14, 8.507059e+37 }
 0xa8e   :  { %v1952_v4 = vpop.eup %1951 }
 0xa8f   :  { %v715_v5 = vmul.f32 %v1952_v4, %v713_v3  ;;  %vm720_vm8 = vweird.f32 %v1952_v4  ;;  %v1954_v22 = vpop.eup %1953 }
 0xa90   :  { %vm721_vm10 = vmor %vm719_vm9, %vm720_vm8 }
 0xa91   :  { %v716_v6 = vsub.f32 1.0, %v715_v5  ;;  %v1875_v5 = vld [vmem:[%s2617_s2] sm:$0xff] }
 0xa93   :  { %v717_v10 = vmul.f32 %v1952_v4, %v716_v6 }
 0xa95   :  { %v718_v15 = vadd.f32 %v1952_v4, %v717_v10 }
 0xa97   :  { %v722_v17 = vsel %vm721_vm10, %v1952_v4, %v718_v15  ;;  %v1876_v4 = vld [vmem:[%s2617_s2 + $0x8] sm:$0xff]  ;;  %v242_v15 = vpop.f32.mrf.mxu0 }
 0xa98   :  { %v727_v20 = vsel %vm724_vm11, %v726_v16, %v722_v17  ;;  %879 = vmatpush.bf16.msrb.mxu1 %v1876_v4  ;;  %v243_v16 = vadd.f32 %v2091_v7, %v242_v15 }
 0xa99   :  { %731 = vrot.lane.b32.xlu1 %v727_v20, %s2038_s1  ;;  %v739_v21 = vmul.f32 %v737_v18, %v727_v20 }
 0xa9b   :  { %741 = vrot.lane.b32.xlu2 %v739_v21, %s2039_s5 }
 0xa9c   :  { %880 = vmatpush.bf16.msrb.mxu1 %v1875_v5 }
 0xaf5   :  { %v742_v25 = vpop.permute.xlu2 %741 }
 0xb0b   :  { %v732_v23 = vpop.permute.xlu1 %731 }
 0xb0c   :  { %v734_v24 = vmul.f32 %v1954_v22, %v732_v23 }
 0xb0e   :  { %v2224_v26 = vadd.f32 %v742_v25, %v734_v24 }
 0xb10   :  { %1955 = vtanh.f32 %v2224_v26  ;;  %824 = vrot.lane.b32.xlu2 %v2224_v26, %s2039_s5 }
 0xb16   :  { %v1956_v27 = vpop.eup %1955 }
 0xb17   :  { %747 = vrot.lane.b32.xlu0 %v1956_v27, %s2038_s1 }
 0xb6a   :  { %v825_v57 = vpop.permute.xlu2 %824 }
 0xb89   :  { %v748_v31 = vpop.permute.xlu0 %747 }
 0xb8a   :  { %v2240_v32 = vmul.f32 %v748_v31, %v727_v20 }
 0xb8c   :  { %v751_v33 = vpack.c.bf16 %v2240_v32, %v2240_v32 }
 0xb8e   :  { %768 = vrot.lane.b32.xlu1 %v751_v33, %s2040_s14 }
 0xc00   :  { %v769_v34 = vpop.permute.xlu1 %768 }
 0xc01   :  { %1747 = vmatmul.msk.bf16.vlgmr.msrb.gmra.mxu3 %vm324_vm5, %v769_v34 }
 0xc84   :  { %v794_v40 = vpop.f32.mrf.mxu3 }
 0xc85   :  { %v798_v41 = vadd.f32 %v794_v40, %v241_v37 }
 0xc87   :  { %v1748_v42 = vmul.f32 -1.442695, %v798_v41 }
 0xc89   :  { %1957 = vpow2.f32 %v1748_v42 }
 0xc8c   :  { %v796_v43 = vpop.f32.mrf.mxu3 }
 0xc8f   :  { %v1958_v44 = vpop.eup %1957 }
 0xc90   :  { %v802_v46 = vadd.f32 1.0, %v1958_v44 }
 0xc92   :  { %1959 = vrcp.f32 %v802_v46  ;;  %v814_v50 = vand.u32 2147483648, %v802_v46  ;;  %v812_v52 = vand.u32 2147483647, %v802_v46  ;;  %vm808_vm13 = vweird.f32 %v802_v46 }
 0xc93   :  { %1961 = vtanh.f32 %v798_v41 }
 0xc94   :  { %v815_v54 = vor.u32 1.1754944e-38, %v814_v50  ;;  %vm813_vm15 = vcmp.eq.f32.partialorder %v812_v52, 8.507059e+37  ;;  %v1877_v50 = vld [vmem:[%s2617_s2] sm:$0xff] }
 0xc98   :  { %v1960_v47 = vpop.eup %1959 }
 0xc99   :  { %v804_v48 = vmul.f32 %v1960_v47, %v802_v46  ;;  %vm809_vm12 = vweird.f32 %v1960_v47  ;;  %v1962_v60 = vpop.eup %1961 }
 0xc9a   :  { %vm810_vm14 = vmor %vm808_vm13, %vm809_vm12 }
 0xc9b   :  { %v805_v49 = vsub.f32 1.0, %v804_v48  ;;  %v1878_v48 = vld [vmem:[%s2617_s2 + $0x8] sm:$0xff] }
 0xc9c   :  { %960 = vmatpush.bf16.msrb.mxu2 %v1878_v48 }
 0xc9d   :  { %v806_v51 = vmul.f32 %v1960_v47, %v805_v49  ;;  %v1853_v49 = vld [vmem:[%s2615_s0 + $0x20] sm:$0xff] }
 0xc9e   :  { %1678 = vmatmul.msk.bf16.gmra.mxu0 %vm191_vm0, %v1853_v49 }
 0xc9f   :  { %v807_v53 = vadd.f32 %v1960_v47, %v806_v51 }
 0xca0   :  { %961 = vmatpush.bf16.msrb.mxu2 %v1877_v50 }
 0xca1   :  { %v811_v56 = vsel %vm810_vm14, %v1960_v47, %v807_v53 }
 0xca2   :  { %v816_v58 = vsel %vm813_vm15, %v815_v54, %v811_v56 }
 0xca3   :  { %820 = vrot.lane.b32.xlu0 %v816_v58, %s2038_s1  ;;  %v827_v59 = vmul.f32 %v825_v57, %v816_v58 }
 0xca5   :  { %829 = vrot.lane.b32.xlu1 %v827_v59, %s2039_s5 }
 0xd15   :  { %v821_v61 = vpop.permute.xlu0 %820 }
 0xd16   :  { %v823_v62 = vmul.f32 %v1962_v60, %v821_v61 }
 0xd17   :  { %v830_v63 = vpop.permute.xlu1 %829 }
 0xd18   :  { %v832_v1 = vadd.f32 %v830_v63, %v823_v62 }
 0xd1a   :  { %1963 = vtanh.f32 %v832_v1  ;;  %846 = vrot.lane.b32.xlu1 %v832_v1, %s2039_s5 }
 0xd1b   :  { %v245_v56 = vpop.f32.mrf.mxu0 }
 0xd1c   :  { %v246_v57 = vadd.f32 %v2091_v7, %v245_v56 }
 0xd20   :  { %v1964_v3 = vpop.eup %1963 }
 0xd21   :  { %835 = vrot.lane.b32.xlu2 %v1964_v3, %s2038_s1 }
 0xd7b   :  { %v836_v6 = vpop.permute.xlu2 %835 }
 0xd7c   :  { %v2257_v9 = vmul.f32 %v836_v6, %v816_v58 }
 0xd7e   :  { %v839_v10 = vpack.c.bf16 %v2257_v9, %v2257_v9 }
 0xd80   :  { %856 = vrot.lane.b32.xlu0 %v839_v10, %s2040_s14 }
 0xd8c   :  { %v2264_v36 = vpop.permute.xlu1 %846 }
 0xdf2   :  { %v857_v14 = vpop.permute.xlu0 %856 }
 0xdf3   :  { %1758 = vmatmul.msk.bf16.vlgmr.msrb.gmra.mxu1 %vm324_vm5, %v857_v14 }
 0xe70   :  { %v882_v17 = vpop.f32.mrf.mxu1 }
 0xe71   :  { %v886_v18 = vadd.f32 %v882_v17, %v243_v16 }
 0xe73   :  { %v1759_v20 = vmul.f32 -1.442695, %v886_v18 }
 0xe75   :  { %1965 = vpow2.f32 %v1759_v20 }
 0xe78   :  { %v884_v21 = vpop.f32.mrf.mxu1 }
 0xe7b   :  { %v1966_v22 = vpop.eup %1965 }
 0xe7c   :  { %v890_v23 = vadd.f32 1.0, %v1966_v22 }
 0xe7e   :  { %1967 = vrcp.f32 %v890_v23  ;;  %v902_v28 = vand.u32 2147483648, %v890_v23  ;;  %v900_v30 = vand.u32 2147483647, %v890_v23  ;;  %vm896_vm2 = vweird.f32 %v890_v23 }
 0xe7f   :  { %1969 = vtanh.f32 %v886_v18 }
 0xe80   :  { %v903_v33 = vor.u32 1.1754944e-38, %v902_v28  ;;  %vm901_vm4 = vcmp.eq.f32.partialorder %v900_v30, 8.507059e+37  ;;  %v1880_v28 = vld [vmem:[%s2617_s2 + $0x8] sm:$0xff] }
 0xe81   :  { %1044 = vmatpush.bf16.msra.mxu3 %v1880_v28 }
 0xe84   :  { %v1968_v24 = vpop.eup %1967 }
 0xe85   :  { %v892_v25 = vmul.f32 %v1968_v24, %v890_v23  ;;  %vm897_vm1 = vweird.f32 %v1968_v24  ;;  %v1970_v42 = vpop.eup %1969 }
 0xe86   :  { %vm898_vm3 = vmor %vm896_vm2, %vm897_vm1 }
 0xe87   :  { %v893_v27 = vsub.f32 1.0, %v892_v25 }
 0xe89   :  { %v894_v29 = vmul.f32 %v1968_v24, %v893_v27 }
 0xe8b   :  { %v895_v31 = vadd.f32 %v1968_v24, %v894_v29  ;;  %v1879_v29 = vld [vmem:[%s2617_s2] sm:$0xff] }
 0xe8c   :  { %1045 = vmatpush.bf16.msra.mxu3 %v1879_v29 }
 0xe8d   :  { %v899_v34 = vsel %vm898_vm3, %v1968_v24, %v895_v31 }
 0xe8e   :  { %v904_v37 = vsel %vm901_vm4, %v903_v33, %v899_v34 }
 0xe8f   :  { %908 = vrot.lane.b32.xlu2 %v904_v37, %s2038_s1  ;;  %v912_v40 = vmul.f32 %v904_v37, %v2264_v36 }
 0xe91   :  { %914 = vrot.lane.b32.xlu0 %v912_v40, %s2039_s5 }
 0xee9   :  { %v909_v41 = vpop.permute.xlu2 %908 }
 0xeea   :  { %v911_v43 = vmul.f32 %v1970_v42, %v909_v41 }
 0xf03   :  { %v915_v44 = vpop.permute.xlu0 %914 }
 0xf04   :  { %v2269_v46 = vadd.f32 %v915_v44, %v911_v43 }
 0xf06   :  { %1971 = vtanh.f32 %v2269_v46  ;;  %993 = vrot.lane.b32.xlu0 %v2269_v46, %s2039_s5 }
 0xf0c   :  { %v1972_v47 = vpop.eup %1971 }
 0xf0d   :  { %920 = vrot.lane.b32.xlu1 %v1972_v47, %s2038_s1 }
 0xf78   :  { %v994_v17 = vpop.permute.xlu0 %993 }
 0xf7f   :  { %v921_v51 = vpop.permute.xlu1 %920 }
 0xf80   :  { %v2285_v52 = vmul.f32 %v921_v51, %v904_v37  ;;  %v247_v37 = vpop.f32.mrf.mxu0 }
 0xf81   :  { %v248_v40 = vadd.f32 %v2091_v7, %v247_v37 }
 0xf82   :  { %v924_v53 = vpack.c.bf16 %v2285_v52, %v2285_v52 }
 0xf84   :  { %937 = vrot.lane.b32.xlu2 %v924_v53, %s2040_s14 }
 0xfde   :  { %v938_v54 = vpop.permute.xlu2 %937 }
 0xfdf   :  { %1769 = vmatmul.msk.bf16.vlgmr.msrb.gmra.mxu2 %vm324_vm5, %v938_v54 }
0x1062   :  { %v963_v58 = vpop.f32.mrf.mxu2 }
0x1063   :  { %v967_v59 = vadd.f32 %v963_v58, %v246_v57 }
0x1065   :  { %v1770_v60 = vmul.f32 -1.442695, %v967_v59 }
0x1067   :  { %1973 = vpow2.f32 %v1770_v60 }
0x106a   :  { %v965_v61 = vpop.f32.mrf.mxu2 }
0x106d   :  { %v1974_v62 = vpop.eup %1973 }
0x106e   :  { %v971_v63 = vadd.f32 1.0, %v1974_v62 }
0x1070   :  { %1975 = vrcp.f32 %v971_v63  ;;  %v983_v5 = vand.u32 2147483648, %v971_v63  ;;  %v981_v10 = vand.u32 2147483647, %v971_v63  ;;  %vm977_vm7 = vweird.f32 %v971_v63 }
0x1071   :  { %1977 = vtanh.f32 %v967_v59 }
0x1072   :  { %v984_v15 = vor.u32 1.1754944e-38, %v983_v5  ;;  %vm982_vm9 = vcmp.eq.f32.partialorder %v981_v10, 8.507059e+37  ;;  %v1882_v10 = vld [vmem:[%s2617_s2 + $0x8] sm:$0xff] }
0x1073   :  { %1133 = vmatpush.bf16.msra.mxu1 %v1882_v10 }
0x1076   :  { %v1976_v1 = vpop.eup %1975 }
0x1077   :  { %v973_v3 = vmul.f32 %v1976_v1, %v971_v63  ;;  %vm978_vm6 = vweird.f32 %v1976_v1  ;;  %v1978_v21 = vpop.eup %1977 }
0x1078   :  { %vm979_vm8 = vmor %vm977_vm7, %vm978_vm6 }
0x1079   :  { %v974_v4 = vsub.f32 1.0, %v973_v3 }
0x107b   :  { %v975_v6 = vmul.f32 %v1976_v1, %v974_v4 }
0x107d   :  { %v976_v14 = vadd.f32 %v1976_v1, %v975_v6 }
0x107f   :  { %v980_v16 = vsel %vm979_vm8, %v1976_v1, %v976_v14  ;;  %v1854_v14 = vld [vmem:[%s2615_s0 + $0x28] sm:$0xff] }
0x1080   :  { %v985_v18 = vsel %vm982_vm9, %v984_v15, %v980_v16  ;;  %1679 = vmatmul.msk.bf16.gmra.mxu0 %vm191_vm0, %v1854_v14  ;;  %v1881_v15 = vld [vmem:[%s2617_s2] sm:$0xff] }
0x1081   :  { %989 = vrot.lane.b32.xlu1 %v985_v18, %s2038_s1  ;;  %v996_v20 = vmul.f32 %v994_v17, %v985_v18  ;;  %1134 = vmatpush.bf16.msra.mxu1 %v1881_v15 }
0x1083   :  { %998 = vrot.lane.b32.xlu2 %v996_v20, %s2039_s5 }
0x10dd   :  { %v999_v24 = vpop.permute.xlu2 %998 }
0x10f3   :  { %v990_v22 = vpop.permute.xlu1 %989 }
0x10f4   :  { %v992_v23 = vmul.f32 %v1978_v21, %v990_v22 }
0x10f6   :  { %v1001_v25 = vadd.f32 %v999_v24, %v992_v23 }
0x10f8   :  { %1979 = vtanh.f32 %v1001_v25  ;;  %1771 = vst.msk [vmem:[%s2616_s4 + $0x30] sm:$0xff] %vm324_vm5, %v1001_v25  ;;  %1078 = vrot.lane.b32.xlu2 %v1001_v25, %s2039_s5 }
0x10fd   :  { %v250_v21 = vpop.f32.mrf.mxu0 }
0x10fe   :  { %v1980_v27 = vpop.eup %1979  ;;  %v251_v22 = vadd.f32 %v2091_v7, %v250_v21 }
0x10ff   :  { %1004 = vrot.lane.b32.xlu0 %v1980_v27, %s2038_s1 }
0x1152   :  { %v1079_v60 = vpop.permute.xlu2 %1078 }
0x1171   :  { %v1005_v30 = vpop.permute.xlu0 %1004 }
0x1172   :  { %v2306_v31 = vmul.f32 %v1005_v30, %v985_v18 }
0x1174   :  { %v1008_v33 = vpack.c.bf16 %v2306_v31, %v2306_v31 }
0x1176   :  { %1021 = vrot.lane.b32.xlu1 %v1008_v33, %s2040_s14 }
0x11e8   :  { %v1022_v34 = vpop.permute.xlu1 %1021 }
0x11e9   :  { %1780 = vmatmul.msk.bf16.vlgmr.msra.gmra.mxu3 %vm324_vm5, %v1022_v34 }
0x126c   :  { %v1047_v41 = vpop.f32.mrf.mxu3 }
0x126d   :  { %v1051_v42 = vadd.f32 %v1047_v41, %v248_v40 }
0x126f   :  { %v1781_v43 = vmul.f32 -1.442695, %v1051_v42 }
0x1271   :  { %1981 = vpow2.f32 %v1781_v43 }
0x1274   :  { %v1049_v44 = vpop.f32.mrf.mxu3 }
0x1277   :  { %v1982_v47 = vpop.eup %1981 }
0x1278   :  { %v1055_v48 = vadd.f32 1.0, %v1982_v47 }
0x127a   :  { %1983 = vrcp.f32 %v1055_v48  ;;  %v1067_v53 = vand.u32 2147483648, %v1055_v48  ;;  %v1065_v56 = vand.u32 2147483647, %v1055_v48  ;;  %vm1061_vm11 = vweird.f32 %v1055_v48 }
0x127b   :  { %1985 = vtanh.f32 %v1051_v42 }
0x127c   :  { %v1068_v58 = vor.u32 1.1754944e-38, %v1067_v53  ;;  %vm1066_vm13 = vcmp.eq.f32.partialorder %v1065_v56, 8.507059e+37 }
0x1280   :  { %v1984_v49 = vpop.eup %1983 }
0x1281   :  { %v1057_v50 = vmul.f32 %v1984_v49, %v1055_v48  ;;  %vm1062_vm10 = vweird.f32 %v1984_v49  ;;  %v1986_v63 = vpop.eup %1985 }
0x1282   :  { %vm1063_vm12 = vmor %vm1061_vm11, %vm1062_vm10 }
0x1283   :  { %v1058_v51 = vsub.f32 1.0, %v1057_v50 }
0x1285   :  { %v1059_v54 = vmul.f32 %v1984_v49, %v1058_v51 }
0x1287   :  { %v1060_v57 = vadd.f32 %v1984_v49, %v1059_v54 }
0x1289   :  { %v1064_v59 = vsel %vm1063_vm12, %v1984_v49, %v1060_v57  ;;  %v1884_v57 = vld [vmem:[%s2617_s2 + $0x8] sm:$0xff] }
0x128a   :  { %v1069_v61 = vsel %vm1066_vm13, %v1068_v58, %v1064_v59  ;;  %1221 = vmatpush.bf16.msra.mxu2 %v1884_v57  ;;  %v1883_v58 = vld [vmem:[%s2617_s2] sm:$0xff] }
0x128b   :  { %1073 = vrot.lane.b32.xlu0 %v1069_v61, %s2038_s1  ;;  %v1081_v62 = vmul.f32 %v1079_v60, %v1069_v61 }
0x128d   :  { %1083 = vrot.lane.b32.xlu1 %v1081_v62, %s2039_s5 }
0x128e   :  { %1222 = vmatpush.bf16.msra.mxu2 %v1883_v58 }
0x12fd   :  { %v1074_v1 = vpop.permute.xlu0 %1073 }
0x12fe   :  { %v1076_v3 = vmul.f32 %v1986_v63, %v1074_v1  ;;  %v252_v63 = vpop.f32.mrf.mxu0  ;;  %v2357_v1 = vld [vmem:[%s2614_s3] ss:$0 sm:$0xff] }
0x12ff   :  { %v1084_v4 = vpop.permute.xlu1 %1083 }
0x1300   :  { %v2315_v5 = vadd.f32 %v1084_v4, %v1076_v3  ;;  %v253_v3 = vadd.f32 %v2357_v1, %v252_v63 }
0x1302   :  { %1987 = vtanh.f32 %v2315_v5  ;;  %1166 = vrot.lane.b32.xlu1 %v2315_v5, %s2039_s5 }
0x1308   :  { %v1988_v6 = vpop.eup %1987 }
0x1309   :  { %1089 = vrot.lane.b32.xlu2 %v1988_v6, %s2038_s1 }
0x1363   :  { %v1090_v16 = vpop.permute.xlu2 %1089 }
0x1364   :  { %v2331_v17 = vmul.f32 %v1090_v16, %v1069_v61 }
0x1366   :  { %v1093_v18 = vpack.c.bf16 %v2331_v17, %v2331_v17 }
0x1368   :  { %1110 = vrot.lane.b32.xlu0 %v1093_v18, %s2040_s14 }
0x1374   :  { %v1167_v44 = vpop.permute.xlu1 %1166 }
0x13da   :  { %v1111_v20 = vpop.permute.xlu0 %1110 }
0x13db   :  { %1791 = vmatmul.msk.bf16.vlgmr.msra.gmra.mxu1 %vm324_vm5, %v1111_v20 }
0x1458   :  { %v1136_v23 = vpop.f32.mrf.mxu1 }
0x1459   :  { %v1140_v24 = vadd.f32 %v1136_v23, %v251_v22 }
0x145b   :  { %v1792_v25 = vmul.f32 -1.442695, %v1140_v24 }
0x145d   :  { %1989 = vpow2.f32 %v1792_v25 }
0x1460   :  { %v1138_v27 = vpop.f32.mrf.mxu1 }
0x1463   :  { %v1990_v28 = vpop.eup %1989 }
0x1464   :  { %v1144_v29 = vadd.f32 1.0, %v1990_v28 }
0x1466   :  { %1991 = vrcp.f32 %v1144_v29  ;;  %v1156_v37 = vand.u32 2147483648, %v1144_v29  ;;  %v1154_v41 = vand.u32 2147483647, %v1144_v29  ;;  %vm1150_vm14 = vweird.f32 %v1144_v29 }
0x1467   :  { %1993 = vtanh.f32 %v1140_v24 }
0x1468   :  { %v1157_v43 = vor.u32 1.1754944e-38, %v1156_v37  ;;  %vm1155_vm1 = vcmp.eq.f32.partialorder %v1154_v41, 8.507059e+37 }
0x146c   :  { %v1992_v30 = vpop.eup %1991 }
0x146d   :  { %v1146_v33 = vmul.f32 %v1992_v30, %v1144_v29  ;;  %vm1151_vm0 = vweird.f32 %v1992_v30  ;;  %v1994_v50 = vpop.eup %1993 }
0x146e   :  { %vm1152_vm15 = vmor %vm1150_vm14, %vm1151_vm0 }
0x146f   :  { %v1147_v34 = vsub.f32 1.0, %v1146_v33 }
0x1471   :  { %v1148_v40 = vmul.f32 %v1992_v30, %v1147_v34 }
0x1473   :  { %v1149_v42 = vadd.f32 %v1992_v30, %v1148_v40 }
0x1475   :  { %v1153_v7 = vsel %vm1152_vm15, %v1992_v30, %v1149_v42 }
0x1476   :  { %v1158_v47 = vsel %vm1155_vm1, %v1157_v43, %v1153_v7  ;;  %v1886_v7 = vld [vmem:[%s2617_s2 + $0x8] sm:$0xff] }
0x1477   :  { %1162 = vrot.lane.b32.xlu2 %v1158_v47, %s2038_s1  ;;  %v1169_v48 = vmul.f32 %v1167_v44, %v1158_v47  ;;  %1302 = vmatpush.bf16.msrb.mxu3 %v1886_v7  ;;  %v1885_v44 = vld [vmem:[%s2617_s2] sm:$0xff] }
0x1479   :  { %1171 = vrot.lane.b32.xlu0 %v1169_v48, %s2039_s5 }
0x147b   :  { %1303 = vmatpush.bf16.msrb.mxu3 %v1885_v44 }
0x14d1   :  { %v1163_v49 = vpop.permute.xlu2 %1162 }
0x14d2   :  { %v1165_v51 = vmul.f32 %v1994_v50, %v1163_v49 }
0x14eb   :  { %v1172_v53 = vpop.permute.xlu0 %1171 }
0x14ec   :  { %v1174_v54 = vadd.f32 %v1172_v53, %v1165_v51  ;;  %v256_v51 = vadd.f32 %v2357_v1, %v2118_v38 }
0x14ee   :  { %1995 = vtanh.f32 %v1174_v54  ;;  %1188 = vrot.lane.b32.xlu0 %v1174_v54, %s2039_s5 }
0x14f4   :  { %v1996_v56 = vpop.eup %1995 }
0x14f5   :  { %1177 = vrot.lane.b32.xlu1 %v1996_v56, %s2038_s1 }
0x1560   :  { %v2360_v29 = vpop.permute.xlu0 %1188 }
0x1567   :  { %v1178_v59 = vpop.permute.xlu1 %1177 }
0x1568   :  { %v2348_v60 = vmul.f32 %v1178_v59, %v1158_v47 }
0x156a   :  { %v1181_v61 = vpack.c.bf16 %v2348_v60, %v2348_v60 }
0x156c   :  { %1198 = vrot.lane.b32.xlu2 %v1181_v61, %s2040_s14 }
0x15c6   :  { %v1199_v62 = vpop.permute.xlu2 %1198 }
0x15c7   :  { %1802 = vmatmul.msk.bf16.vlgmr.msra.gmra.mxu2 %vm324_vm5, %v1199_v62 }
0x164a   :  { %v1224_v4 = vpop.f32.mrf.mxu2 }
0x164b   :  { %v1228_v6 = vadd.f32 %v1224_v4, %v253_v3 }
0x164d   :  { %v1803_v10 = vmul.f32 -1.442695, %v1228_v6 }
0x164f   :  { %1997 = vpow2.f32 %v1803_v10 }
0x1652   :  { %v1226_v14 = vpop.f32.mrf.mxu2 }
0x1655   :  { %v1998_v15 = vpop.eup %1997 }
0x1656   :  { %v1232_v16 = vadd.f32 1.0, %v1998_v15 }
0x1658   :  { %1999 = vrcp.f32 %v1232_v16  ;;  %v1244_v22 = vand.u32 2147483648, %v1232_v16  ;;  %v1242_v24 = vand.u32 2147483647, %v1232_v16  ;;  %vm1238_vm3 = vweird.f32 %v1232_v16 }
0x1659   :  { %2001 = vtanh.f32 %v1228_v6 }
0x165a   :  { %v1245_v27 = vor.u32 1.1754944e-38, %v1244_v22  ;;  %vm1243_vm6 = vcmp.eq.f32.partialorder %v1242_v24, 8.507059e+37 }
0x165e   :  { %v2000_v18 = vpop.eup %1999 }
0x165f   :  { %v1234_v20 = vmul.f32 %v2000_v18, %v1232_v16  ;;  %vm1239_vm2 = vweird.f32 %v2000_v18  ;;  %v2002_v34 = vpop.eup %2001 }
0x1660   :  { %vm1240_vm4 = vmor %vm1238_vm3, %vm1239_vm2  ;;  %vm411_vm3 = vcmask 523520  }
0x1661   :  { %v1235_v21 = vsub.f32 1.0, %v1234_v20 }
0x1663   :  { %v1236_v23 = vmul.f32 %v2000_v18, %v1235_v21 }
0x1665   :  { %v1237_v25 = vadd.f32 %v2000_v18, %v1236_v23 }
0x1667   :  { %v1241_v28 = vsel %vm1240_vm4, %v2000_v18, %v1237_v25  ;;  %vm500_vm4 = vcmask 785920  }
0x1668   :  { %v1246_v30 = vsel %vm1243_vm6, %v1245_v27, %v1241_v28  ;;  %v1888_v27 = vld [vmem:[%s2617_s2 + $0x8] sm:$0xff]  ;;  %v1887_v28 = vld [vmem:[%s2617_s2] sm:$0xff]  ;;  %vm582_vm6 = vcmask 1048320  }
0x1669   :  { %1250 = vrot.lane.b32.xlu1 %v1246_v30, %s2038_s1  ;;  %v1254_v33 = vmul.f32 %v1246_v30, %v2360_v29  ;;  %1386 = vmatpush.bf16.msrb.mxu1 %v1888_v27 }
0x166b   :  { %1256 = vrot.lane.b32.xlu2 %v1254_v33, %s2039_s5 }
0x166d   :  { %1387 = vmatpush.bf16.msrb.mxu1 %v1887_v28 }
0x16c5   :  { %v1257_v41 = vpop.permute.xlu2 %1256 }
0x16db   :  { %v1251_v37 = vpop.permute.xlu1 %1250 }
0x16dc   :  { %v1253_v40 = vmul.f32 %v2002_v34, %v1251_v37 }
0x16de   :  { %v2365_v42 = vadd.f32 %v1257_v41, %v1253_v40  ;;  %v258_v40 = vadd.f32 %v2357_v1, %v2120_v39 }
0x16e0   :  { %2003 = vtanh.f32 %v2365_v42  ;;  %1335 = vrot.lane.b32.xlu2 %v2365_v42, %s2039_s5 }
0x16e6   :  { %v2004_v43 = vpop.eup %2003 }
0x16e7   :  { %1262 = vrot.lane.b32.xlu0 %v2004_v43, %s2038_s1 }
0x173a   :  { %v1336_v15 = vpop.permute.xlu2 %1335 }
0x1759   :  { %v1263_v47 = vpop.permute.xlu0 %1262 }
0x175a   :  { %v2377_v48 = vmul.f32 %v1263_v47, %v1246_v30 }
0x175c   :  { %v1266_v49 = vpack.c.bf16 %v2377_v48, %v2377_v48 }
0x175e   :  { %1279 = vrot.lane.b32.xlu1 %v1266_v49, %s2040_s14 }
0x17d0   :  { %v1280_v50 = vpop.permute.xlu1 %1279 }
0x17d1   :  { %1813 = vmatmul.msk.bf16.vlgmr.msrb.gmra.mxu3 %vm324_vm5, %v1280_v50 }
0x1854   :  { %v1305_v53 = vpop.f32.mrf.mxu3 }
0x1855   :  { %v1309_v54 = vadd.f32 %v1305_v53, %v256_v51 }
0x1857   :  { %v1814_v56 = vmul.f32 -1.442695, %v1309_v54 }
0x1859   :  { %2005 = vpow2.f32 %v1814_v56 }
0x185c   :  { %v1307_v57 = vpop.f32.mrf.mxu3 }
0x185f   :  { %v2006_v58 = vpop.eup %2005 }
0x1860   :  { %v1313_v59 = vadd.f32 1.0, %v2006_v58 }
0x1862   :  { %2007 = vrcp.f32 %v1313_v59  ;;  %v1325_v3 = vand.u32 2147483648, %v1313_v59  ;;  %v1323_v6 = vand.u32 2147483647, %v1313_v59  ;;  %vm1319_vm8 = vweird.f32 %v1313_v59 }
0x1863   :  { %2009 = vtanh.f32 %v1309_v54 }
0x1864   :  { %v1326_v14 = vor.u32 1.1754944e-38, %v1325_v3  ;;  %vm1324_vm10 = vcmp.eq.f32.partialorder %v1323_v6, 8.507059e+37 }
0x1868   :  { %v2008_v61 = vpop.eup %2007 }
0x1869   :  { %v1315_v62 = vmul.f32 %v2008_v61, %v1313_v59  ;;  %vm1320_vm7 = vweird.f32 %v2008_v61  ;;  %v2010_v20 = vpop.eup %2009 }
0x186a   :  { %vm1321_vm9 = vmor %vm1319_vm8, %vm1320_vm7 }
0x186b   :  { %v1316_v63 = vsub.f32 1.0, %v1315_v62 }
0x186d   :  { %v1317_v4 = vmul.f32 %v2008_v61, %v1316_v63 }
0x186f   :  { %v1318_v10 = vadd.f32 %v2008_v61, %v1317_v4 }
0x1871   :  { %v1322_v38 = vsel %vm1321_vm9, %v2008_v61, %v1318_v10 }
0x1872   :  { %v1327_v16 = vsel %vm1324_vm10, %v1326_v14, %v1322_v38 }
0x1873   :  { %1331 = vrot.lane.b32.xlu0 %v1327_v16, %s2038_s1  ;;  %v1338_v18 = vmul.f32 %v1336_v15, %v1327_v16  ;;  %v1890_v15 = vld [vmem:[%s2617_s2 + $0x8] sm:$0xff] }
0x1874   :  { %1475 = vmatpush.bf16.msrb.mxu2 %v1890_v15  ;;  %v263_v15 = vadd.f32 %v2357_v1, %v2153_v12 }
0x1875   :  { %1340 = vrot.lane.b32.xlu1 %v1338_v18, %s2039_s5 }
0x18e5   :  { %v1332_v21 = vpop.permute.xlu0 %1331 }
0x18e6   :  { %v1334_v22 = vmul.f32 %v2010_v20, %v1332_v21 }
0x18e7   :  { %v1341_v23 = vpop.permute.xlu1 %1340 }
0x18e8   :  { %v1343_v24 = vadd.f32 %v1341_v23, %v1334_v22  ;;  %v261_v23 = vadd.f32 %v2357_v1, %v2151_v11 }
0x18ea   :  { %2011 = vtanh.f32 %v1343_v24  ;;  %1815 = vst.msk [vmem:[%s2616_s4 + $0x38] sm:$0xff] %vm324_vm5, %v1343_v24  ;;  %1420 = vrot.lane.b32.xlu1 %v1343_v24, %s2039_s5 }
0x18f0   :  { %v2012_v25 = vpop.eup %2011 }
0x18f1   :  { %1346 = vrot.lane.b32.xlu2 %v2012_v25, %s2038_s1 }
0x194b   :  { %v1347_v30 = vpop.permute.xlu2 %1346 }
0x194c   :  { %v2399_v33 = vmul.f32 %v1347_v30, %v1327_v16  ;;  %v1889_v16 = vld [vmem:[%s2617_s2] sm:$0xff] }
0x194d   :  { %1476 = vmatpush.bf16.msrb.mxu2 %v1889_v16 }
0x194e   :  { %v1350_v34 = vpack.c.bf16 %v2399_v33, %v2399_v33 }
0x1950   :  { %1363 = vrot.lane.b32.xlu0 %v1350_v34, %s2040_s14 }
0x195c   :  { %v1421_v61 = vpop.permute.xlu1 %1420 }
0x19c2   :  { %v1364_v37 = vpop.permute.xlu0 %1363 }
0x19c3   :  { %1824 = vmatmul.msk.bf16.vlgmr.msrb.gmra.mxu1 %vm324_vm5, %v1364_v37 }
0x1a40   :  { %v1389_v41 = vpop.f32.mrf.mxu1 }
0x1a41   :  { %v1393_v43 = vadd.f32 %v1389_v41, %v258_v40 }
0x1a43   :  { %v1825_v7 = vmul.f32 -1.442695, %v1393_v43 }
0x1a45   :  { %2013 = vpow2.f32 %v1825_v7 }
0x1a48   :  { %v1391_v44 = vpop.f32.mrf.mxu1 }
0x1a4b   :  { %v2014_v47 = vpop.eup %2013 }
0x1a4c   :  { %v1397_v49 = vadd.f32 1.0, %v2014_v47 }
0x1a4e   :  { %2015 = vrcp.f32 %v1397_v49  ;;  %v1409_v54 = vand.u32 2147483648, %v1397_v49  ;;  %v1407_v57 = vand.u32 2147483647, %v1397_v49  ;;  %vm1403_vm12 = vweird.f32 %v1397_v49 }
0x1a4f   :  { %2017 = vtanh.f32 %v1393_v43 }
0x1a50   :  { %v1410_v59 = vor.u32 1.1754944e-38, %v1409_v54  ;;  %vm1408_vm0 = vcmp.eq.f32.partialorder %v1407_v57, 8.507059e+37 }
0x1a54   :  { %v2016_v50 = vpop.eup %2015 }
0x1a55   :  { %v1399_v51 = vmul.f32 %v2016_v50, %v1397_v49  ;;  %vm1404_vm11 = vweird.f32 %v2016_v50  ;;  %v2018_v4 = vpop.eup %2017 }
0x1a56   :  { %vm1405_vm13 = vmor %vm1403_vm12, %vm1404_vm11 }
0x1a57   :  { %v1400_v53 = vsub.f32 1.0, %v1399_v51 }
0x1a59   :  { %v1401_v56 = vmul.f32 %v2016_v50, %v1400_v53 }
0x1a5b   :  { %v1402_v58 = vadd.f32 %v2016_v50, %v1401_v56 }
0x1a5d   :  { %v1406_v39 = vsel %vm1405_vm13, %v2016_v50, %v1402_v58 }
0x1a5e   :  { %v1411_v62 = vsel %vm1408_vm0, %v1410_v59, %v1406_v39 }
0x1a5f   :  { %1415 = vrot.lane.b32.xlu2 %v1411_v62, %s2038_s1  ;;  %v1423_v63 = vmul.f32 %v1421_v61, %v1411_v62 }
0x1a61   :  { %1425 = vrot.lane.b32.xlu0 %v1423_v63, %s2039_s5 }
0x1ab9   :  { %v1416_v3 = vpop.permute.xlu2 %1415 }
0x1aba   :  { %v1418_v6 = vmul.f32 %v2018_v4, %v1416_v3 }
0x1ad3   :  { %v1426_v10 = vpop.permute.xlu0 %1425 }
0x1ad4   :  { %v2409_v14 = vadd.f32 %v1426_v10, %v1418_v6 }
0x1ad6   :  { %2019 = vtanh.f32 %v2409_v14  ;;  %1508 = vrot.lane.b32.xlu0 %v2409_v14, %s2039_s5 }
0x1adc   :  { %v2020_v38 = vpop.eup %2019 }
0x1add   :  { %1431 = vrot.lane.b32.xlu1 %v2020_v38, %s2038_s1 }
0x1b48   :  { %v1509_v50 = vpop.permute.xlu0 %1508 }
0x1b4f   :  { %v1432_v18 = vpop.permute.xlu1 %1431 }
0x1b50   :  { %v1434_v20 = vmul.f32 %v1432_v18, %v1411_v62 }
0x1b52   :  { %v1435_v21 = vpack.c.bf16 %v1434_v20, %v1434_v20 }
0x1b54   :  { %1452 = vrot.lane.b32.xlu2 %v1435_v21, %s2040_s14 }
0x1bae   :  { %v1453_v22 = vpop.permute.xlu2 %1452 }
0x1baf   :  { %1835 = vmatmul.msk.bf16.vlgmr.msrb.gmra.mxu2 %vm324_vm5, %v1453_v22 }
0x1c32   :  { %v1478_v24 = vpop.f32.mrf.mxu2 }
0x1c33   :  { %v1482_v25 = vadd.f32 %v1478_v24, %v261_v23 }
0x1c35   :  { %v1836_v27 = vmul.f32 -1.442695, %v1482_v25 }
0x1c37   :  { %2021 = vpow2.f32 %v1836_v27 }
0x1c3a   :  { %v1480_v28 = vpop.f32.mrf.mxu2 }
0x1c3d   :  { %v2022_v30 = vpop.eup %2021 }
0x1c3e   :  { %v1486_v34 = vadd.f32 1.0, %v2022_v30 }
0x1c40   :  { %2023 = vrcp.f32 %v1486_v34  ;;  %v1498_v43 = vand.u32 2147483648, %v1486_v34  ;;  %v1496_v44 = vand.u32 2147483647, %v1486_v34  ;;  %vm1492_vm15 = vweird.f32 %v1486_v34 }
0x1c41   :  { %2025 = vtanh.f32 %v1482_v25 }
0x1c42   :  { %v1499_v49 = vor.u32 1.1754944e-38, %v1498_v43  ;;  %vm1497_vm2 = vcmp.eq.f32.partialorder %v1496_v44, 8.507059e+37 }
0x1c46   :  { %v2024_v37 = vpop.eup %2023 }
0x1c47   :  { %v1488_v40 = vmul.f32 %v2024_v37, %v1486_v34  ;;  %vm1493_vm14 = vweird.f32 %v2024_v37  ;;  %v2026_v54 = vpop.eup %2025 }
0x1c48   :  { %vm1494_vm1 = vmor %vm1492_vm15, %vm1493_vm14 }
0x1c49   :  { %v1489_v41 = vsub.f32 1.0, %v1488_v40 }
0x1c4b   :  { %v1490_v7 = vmul.f32 %v2024_v37, %v1489_v41 }
0x1c4d   :  { %v1491_v47 = vadd.f32 %v2024_v37, %v1490_v7 }
0x1c4f   :  { %v1495_v11 = vsel %vm1494_vm1, %v2024_v37, %v1491_v47 }
0x1c50   :  { %v1500_v51 = vsel %vm1497_vm2, %v1499_v49, %v1495_v11 }
0x1c51   :  { %1504 = vrot.lane.b32.xlu1 %v1500_v51, %s2038_s1  ;;  %v1511_v53 = vmul.f32 %v1509_v50, %v1500_v51 }
0x1c53   :  { %1513 = vrot.lane.b32.xlu2 %v1511_v53, %s2039_s5 }
0x1cad   :  { %v1514_v58 = vpop.permute.xlu2 %1513 }
0x1cc3   :  { %v1505_v56 = vpop.permute.xlu1 %1504 }
0x1cc4   :  { %v1507_v57 = vmul.f32 %v2026_v54, %v1505_v56 }
0x1cc6   :  { %v1516_v59 = vadd.f32 %v1514_v58, %v1507_v57 }
0x1cc8   :  { %2027 = vtanh.f32 %v1516_v59  ;;  %1530 = vrot.lane.b32.xlu2 %v1516_v59, %s2039_s5 }
0x1cce   :  { %v2028_v39 = vpop.eup %2027 }
0x1ccf   :  { %1519 = vrot.lane.b32.xlu0 %v2028_v39, %s2038_s1 }
0x1cd0   :  { %321 = vrot.lane.b32.xlu2 %v2112_v35, %s2040_s14 }
0x1cd8   :  { %497 = vrot.lane.b32.xlu2 %v2166_v45, %s2038_s1 }
0x1ce0   :  { %753 = vrot.lane.b32.xlu2 %v2240_v32, %s2039_s5 }
0x1ce8   :  { %758 = vrot.lane.b32.xlu2 %v2224_v26, %s2040_s14  ;;  %v1892_v26 = vld [vmem:[%s2617_s2 + $0x8] sm:$0xff] }
0x1ce9   :  { %1563 = vmatpush.bf16.msra.mxu3 %v1892_v26 }
0x1cf0   :  { %1437 = vrot.lane.b32.xlu2 %v1434_v20, %s2039_s5 }
0x1cf8   :  { %841 = vrot.lane.b32.xlu2 %v2257_v9, %s2038_s1  ;;  %v1891_v9 = vld [vmem:[%s2617_s2] sm:$0xff] }
0x1cf9   :  { %1564 = vmatpush.bf16.msra.mxu3 %v1891_v9 }
0x1d00   :  { %927 = vrot.lane.b32.xlu2 %v2269_v46, %s2038_s1 }
0x1d22   :  { %v2442_v61 = vpop.permute.xlu2 %1530 }
0x1d2a   :  { %v322_v35 = vpop.permute.xlu2 %321 }
0x1d2b   :  { %325 = vst.msk [vmem:[%s2616_s4] sm:$0xff] %vm324_vm5, %v322_v35 }
0x1d32   :  { %v2448_v45 = vpop.permute.xlu2 %497 }
0x1d3a   :  { %v2450_v32 = vpop.permute.xlu2 %753 }
0x1d41   :  { %v1520_v46 = vpop.permute.xlu0 %1519 }
0x1d42   :  { %v1522_v62 = vmul.f32 %v1520_v46, %v1500_v51  ;;  %v759_v63 = vpop.permute.xlu2 %758 }
0x1d43   :  { %1738 = vst.msk [vmem:[%s2616_s4 + $0x28] sm:$0xff] %vm411_vm3, %v759_v63 }
0x1d44   :  { %v1523_v3 = vpack.c.bf16 %v1522_v62, %v1522_v62  ;;  %1749 = vst.msk [vmem:[%s2616_s4 + $0x28] sm:$0xff] %vm500_vm4, %v2264_v36 }
0x1d46   :  { %1540 = vrot.lane.b32.xlu1 %v1523_v3, %s2040_s14 }
0x1d4a   :  { %v2468_v4 = vpop.permute.xlu2 %1437 }
0x1d52   :  { %v2470_v6 = vpop.permute.xlu2 %841 }
0x1d5a   :  { %v928_v10 = vpop.permute.xlu2 %927 }
0x1d5b   :  { %1760 = vst.msk [vmem:[%s2616_s4 + $0x28] sm:$0xff] %vm582_vm6, %v928_v10 }
0x1db8   :  { %v1541_v38 = vpop.permute.xlu1 %1540 }
0x1db9   :  { %1846 = vmatmul.msk.bf16.vlgmr.msra.gmra.mxu3 %vm324_vm5, %v1541_v38 }
0x1e3c   :  { %v1566_v36 = vpop.f32.mrf.mxu3 }
0x1e3d   :  { %v1570_v16 = vadd.f32 %v1566_v36, %v263_v15 }
0x1e3f   :  { %v1847_v18 = vmul.f32 -1.442695, %v1570_v16 }
0x1e41   :  { %2029 = vpow2.f32 %v1847_v18 }
0x1e44   :  { %v1568_v20 = vpop.f32.mrf.mxu3 }
0x1e47   :  { %v2030_v21 = vpop.eup %2029 }
0x1e48   :  { %v1574_v22 = vadd.f32 1.0, %v2030_v21 }
0x1e4a   :  { %2031 = vrcp.f32 %v1574_v22  ;;  %v1586_v27 = vand.u32 2147483648, %v1574_v22  ;;  %v1584_v30 = vand.u32 2147483647, %v1574_v22  ;;  %vm1580_vm8 = vweird.f32 %v1574_v22 }
0x1e4b   :  { %2033 = vtanh.f32 %v1570_v16 }
0x1e4c   :  { %v1587_v37 = vor.u32 1.1754944e-38, %v1586_v27  ;;  %vm1585_vm10 = vcmp.eq.f32.partialorder %v1584_v30, 8.507059e+37 }
0x1e50   :  { %v2032_v23 = vpop.eup %2031 }
0x1e51   :  { %v1576_v24 = vmul.f32 %v2032_v23, %v1574_v22  ;;  %vm1581_vm7 = vweird.f32 %v2032_v23 }
0x1e52   :  { %vm1582_vm9 = vmor %vm1580_vm8, %vm1581_vm7 }
0x1e53   :  { %v1577_v25 = vsub.f32 1.0, %v1576_v24 }
0x1e55   :  { %v1578_v28 = vmul.f32 %v2032_v23, %v1577_v25 }
0x1e57   :  { %v1579_v34 = vadd.f32 %v2032_v23, %v1578_v28 }
0x1e59   :  { %v1583_v12 = vsel %vm1582_vm9, %v2032_v23, %v1579_v34 }
0x1e5a   :  { %v1588_v1 = vsel %vm1585_vm10, %v1587_v37, %v1583_v12 }
0x1e5b   :  { %1592 = vrot.lane.b32.xlu0 %v1588_v1, %s2038_s1  ;;  %v1596_v40 = vmul.f32 %v1588_v1, %v2442_v61 }
0x1e5d   :  { %1598 = vrot.lane.b32.xlu1 %v1596_v40, %s2039_s5 }
0x1e63   :  { %408 = vrot.lane.b32.xlu0 %v2145_v8, %s2039_s5 }
0x1e65   :  { %414 = vrot.lane.b32.xlu1 %v2125_v0, %s2040_s14  ;;  %v2034_v0 = vpop.eup %2033 }
0x1e6b   :  { %585 = vrot.lane.b32.xlu0 %v2178_v13, %s2038_s1 }
0x1e6d   :  { %668 = vrot.lane.b32.xlu1 %v2215_v55, %s2040_s14 }
0x1e73   :  { %1010 = vrot.lane.b32.xlu0 %v2306_v31, %s2040_s14 }
0x1e75   :  { %1352 = vrot.lane.b32.xlu1 %v2399_v33, %s2040_s14 }
0x1e7b   :  { %1095 = vrot.lane.b32.xlu0 %v2331_v17, %s2039_s5 }
0x1e7d   :  { %1100 = vrot.lane.b32.xlu1 %v2315_v5, %s2040_s14 }
0x1e83   :  { %1442 = vrot.lane.b32.xlu0 %v2409_v14, %s2040_s14 }
0x1e85   :  { %1525 = vrot.lane.b32.xlu1 %v1522_v62, %s2038_s1 }
0x1e8b   :  { %1183 = vrot.lane.b32.xlu0 %v2348_v60, %s2038_s1 }
0x1e93   :  { %1269 = vrot.lane.b32.xlu0 %v2365_v42, %s2038_s1 }
0x1ecd   :  { %v1593_v8 = vpop.permute.xlu0 %1592 }
0x1ece   :  { %v1595_v13 = vmul.f32 %v2034_v0, %v1593_v8 }
0x1ecf   :  { %v1599_v55 = vpop.permute.xlu1 %1598 }
0x1ed0   :  { %v1601_v31 = vadd.f32 %v1599_v55, %v1595_v13 }
0x1ed2   :  { %2035 = vtanh.f32 %v1601_v31 }
0x1ed5   :  { %v409_v17 = vpop.permute.xlu0 %408 }
0x1ed6   :  { %412 = vst.msk [vmem:[%s2616_s4] sm:$0xff] %vm411_vm3, %v409_v17 }
0x1ed7   :  { %501 = vst.msk [vmem:[%s2616_s4] sm:$0xff] %vm500_vm4, %v2448_v45  ;;  %v415_v5 = vpop.permute.xlu1 %414 }
0x1ed8   :  { %v2036_v60 = vpop.eup %2035  ;;  %583 = vst.msk [vmem:[%s2616_s4] sm:$0xff] %vm582_vm6, %v2194_v19 }
0x1ed9   :  { %1694 = vst.msk [vmem:[%s2616_s4 + $0x20] sm:$0xff] %vm411_vm3, %v415_v5  ;;  %1604 = vrot.lane.b32.xlu1 %v2036_v60, %s2038_s1 }
0x1eda   :  { %1705 = vst.msk [vmem:[%s2616_s4 + $0x20] sm:$0xff] %vm500_vm4, %v2173_v2 }
0x1edd   :  { %v586_v42 = vpop.permute.xlu0 %585 }
0x1ede   :  { %1716 = vst.msk [vmem:[%s2616_s4 + $0x20] sm:$0xff] %vm582_vm6, %v586_v42 }
0x1edf   :  { %v669_v19 = vpop.permute.xlu1 %668 }
0x1ee0   :  { %671 = vst.msk [vmem:[%s2616_s4 + $0x8] sm:$0xff] %vm324_vm5, %v669_v19 }
0x1ee1   :  { %756 = vst.msk [vmem:[%s2616_s4 + $0x8] sm:$0xff] %vm411_vm3, %v2450_v32  ;;  %1610 = vrot.lane.b32.xlu1 %v1601_v31, %s2038_s1 }
0x1ee2   :  { %844 = vst.msk [vmem:[%s2616_s4 + $0x8] sm:$0xff] %vm500_vm4, %v2470_v6 }
0x1ee3   :  { %925 = vst.msk [vmem:[%s2616_s4 + $0x8] sm:$0xff] %vm582_vm6, %v2285_v52 }
0x1ee5   :  { %v1011_v2 = vpop.permute.xlu0 %1010 }
0x1ee6   :  { %1013 = vst.msk [vmem:[%s2616_s4 + $0x10] sm:$0xff] %vm324_vm5, %v1011_v2 }
0x1ee7   :  { %v1353_v33 = vpop.permute.xlu1 %1352 }
0x1ee8   :  { %1355 = vst.msk [vmem:[%s2616_s4 + $0x18] sm:$0xff] %vm324_vm5, %v1353_v33 }
0x1ee9   :  { %1440 = vst.msk [vmem:[%s2616_s4 + $0x18] sm:$0xff] %vm411_vm3, %v2468_v4 }
0x1eed   :  { %v1096_v14 = vpop.permute.xlu0 %1095 }
0x1eee   :  { %1098 = vst.msk [vmem:[%s2616_s4 + $0x10] sm:$0xff] %vm411_vm3, %v1096_v14 }
0x1eef   :  { %v1101_v52 = vpop.permute.xlu1 %1100 }
0x1ef0   :  { %1782 = vst.msk [vmem:[%s2616_s4 + $0x30] sm:$0xff] %vm411_vm3, %v1101_v52 }
0x1ef1   :  { %1793 = vst.msk [vmem:[%s2616_s4 + $0x30] sm:$0xff] %vm500_vm4, %v2360_v29 }
0x1ef5   :  { %v1443_v41 = vpop.permute.xlu0 %1442 }
0x1ef6   :  { %1826 = vst.msk [vmem:[%s2616_s4 + $0x38] sm:$0xff] %vm411_vm3, %v1443_v41 }
0x1ef7   :  { %1837 = vst.msk [vmem:[%s2616_s4 + $0x38] sm:$0xff] %vm500_vm4, %v2442_v61  ;;  %v1526_v43 = vpop.permute.xlu1 %1525 }
0x1ef8   :  { %1528 = vst.msk [vmem:[%s2616_s4 + $0x18] sm:$0xff] %vm500_vm4, %v1526_v43 }
0x1efd   :  { %v1184_v7 = vpop.permute.xlu0 %1183 }
0x1efe   :  { %1186 = vst.msk [vmem:[%s2616_s4 + $0x10] sm:$0xff] %vm500_vm4, %v1184_v7 }
0x1eff   :  { %1267 = vst.msk [vmem:[%s2616_s4 + $0x10] sm:$0xff] %vm582_vm6, %v2377_v48 }
0x1f05   :  { %v1270_v29 = vpop.permute.xlu0 %1269 }
0x1f06   :  { %1804 = vst.msk [vmem:[%s2616_s4 + $0x30] sm:$0xff] %vm582_vm6, %v1270_v29 }
0x1f4b   :  { %v1605_v44 = vpop.permute.xlu1 %1604 }
0x1f4c   :  { %v1607_v47 = vmul.f32 %v1605_v44, %v1588_v1 }
0x1f4e   :  { %1608 = vst.msk [vmem:[%s2616_s4 + $0x18] sm:$0xff] %vm582_vm6, %v1607_v47 }
0x1f53   :  { %v1611_v49 = vpop.permute.xlu1 %1610 }
0x1f54   :  { %1848 = vst.msk [vmem:[%s2616_s4 + $0x38] sm:$0xff] %vm582_vm6, %v1611_v49 }

</bundles_post_ra>
